<compile_context>
chip_gen: v5e
topology: v5e:2x2
jax: 0.10.0
libtpu: 0.0.40
codegen_flags: <defaults>
</compile_context>

<pallas_src>
import functools

import numpy as np
import jax
import jax.numpy as jnp
from jax.experimental import pallas as pl
from jax.experimental.pallas import tpu as pltpu

KERNEL = 7
PAD = 3  # Conv2d(2, 1, 7, padding=3) -> "same"


# -----------------------------------------------------------------------------
# Hardware queries / small helpers
# -----------------------------------------------------------------------------
@functools.lru_cache(maxsize=1)
def _vmem_capacity_bytes():
    try:
        info = pltpu.get_tpu_info()
        cap = int(getattr(info, "vmem_capacity_bytes", 0))
        if cap > 0:
            return cap
    except Exception:
        pass
    return 64 * 1024 * 1024  # conservative (v7x-sized) default


def _vmem_limit(est_bytes, cap):
    """Explicit scoped-VMEM limit: generous floor, never above ~90% of physical."""
    return int(min(max(int(est_bytes), 16 << 20), int(cap * 0.9)))


def _row_granule(dtype):
    """Sublane granule for the second-minor block dim (f32:8, bf16:16, int8:32)."""
    return {4: 8, 2: 16, 1: 32}.get(jnp.dtype(dtype).itemsize, 8)


def _const_block_spec(block_shape, index_map, single_buffer):
    """BlockSpec for a grid-constant operand.

    A constant-index operand only ever needs one VMEM buffer; the second
    pipeline buffer is pure VMEM waste (review item 1).  Fall back to the
    default spec if pipeline_mode / Buffered(1) is unavailable.
    """
    if single_buffer and hasattr(pl, "Buffered"):
        try:
            return pl.BlockSpec(block_shape, index_map,
                                pipeline_mode=pl.Buffered(1))
        except TypeError:
            pass
    return pl.BlockSpec(block_shape, index_map)


# -----------------------------------------------------------------------------
# Wrapper-side construction of weight-baked conv matrices (MXU operands).
# Index/mask tensors are cached on (H, W); under jit the whole construction
# constant-folds (review item 13).
# -----------------------------------------------------------------------------
@functools.lru_cache(maxsize=4)
def _full_toeplitz_indices(H, W):
    dh = np.arange(H)[:, None] - np.arange(H)[None, :] + PAD      # (h_in, h_out)
    dw = np.arange(W)[:, None] - np.arange(W)[None, :] + PAD      # (w_in, w_out)
    vh = (dh >= 0) & (dh < KERNEL)
    vw = (dw >= 0) & (dw < KERNEL)
    valid = vh[:, None, :, None] & vw[None, :, None, :]           # (h_in, w_in, h_out, w_out)
    kh = np.broadcast_to(np.clip(dh, 0, KERNEL - 1)[:, None, :, None], valid.shape)
    kw = np.broadcast_to(np.clip(dw, 0, KERNEL - 1)[None, :, None, :], valid.shape)
    return np.ascontiguousarray(kh), np.ascontiguousarray(kw), valid


def _build_full_conv_matrix(w, H, W, dtype):
    """(1,2,7,7) weight -> (2*H*W, H*W) block-Toeplitz 'same'-conv matrix:
    conv_flat = concat([mean_flat, max_flat], -1) @ T (zero padding baked in)."""
    kh, kw, valid = _full_toeplitz_indices(H, W)
    HW = H * W
    blocks = [(w[0, c][kh, kw] * valid).reshape(HW, HW) for c in range(2)]
    return jnp.concatenate(blocks, axis=0).astype(dtype)          # (2*HW, HW)


@functools.lru_cache(maxsize=8)
def _banded_indices(W):
    dw = np.arange(W)[:, None] - np.arange(W)[None, :] + PAD      # (w_in, w_out)
    valid = (dw >= 0) & (dw < KERNEL)
    return np.clip(dw, 0, KERNEL - 1), valid


def _build_banded_cat_matrix(w, W, dtype):
    """(1,2,7,7) weight -> (2W, 7W): column block kh holds the per-kh banded
    Toeplitz T[kh] so   conv = sum_kh (P @ T_cat)[kh:kh+TH, kh*W:(kh+1)*W]."""
    dw_c, valid = _banded_indices(W)
    rows = []
    for c in range(2):                                            # 0 = mean, 1 = max
        cols = [w[0, c][kh, dw_c] * valid for kh in range(KERNEL)]  # each (W, W)
        rows.append(jnp.concatenate(cols, axis=1))                # (W, 7W)
    return jnp.concatenate(rows, axis=0).astype(dtype)            # (2W, 7W)


# -----------------------------------------------------------------------------
# Kernels
# -----------------------------------------------------------------------------
def _flat_kernel(x_ref, t_ref, o_ref):
    """Lane-dense path.  x_ref/o_ref: (NB, C, H*W); t_ref: (2*H*W, H*W)."""
    x = x_ref[...]                                                # source dtype
    mean_f = jnp.mean(x, axis=1, dtype=jnp.float32)               # (NB, HW)
    max_f = jnp.max(x, axis=1).astype(jnp.float32)                # (NB, HW)
    feats = jnp.concatenate([mean_f, max_f], axis=-1).astype(t_ref.dtype)
    conv = jnp.dot(feats, t_ref[...], preferred_element_type=jnp.float32)
    att = jax.nn.sigmoid(conv).astype(x.dtype)                    # (NB, HW)
    o_ref[...] = x * att[:, None, :]                              # multiply in src dtype


def _make_banded_kernel(TH, W, n_h, use_halo):
    """H-tiled path.  x blocks: (1, C, TH, W); t: (2W, 7W); halos: (1, C, HB, W)."""

    def plane_of(xcw):  # (C, R, W) -> (R, 2W) f32  ==  [channel mean | channel max]
        m = jnp.mean(xcw, axis=0, dtype=jnp.float32)
        mx = jnp.max(xcw, axis=0).astype(jnp.float32)
        return jnp.concatenate([m, mx], axis=-1)

    def conv_apply(p_padded, t_ref, x, o_ref):
        # p_padded: (TH + 2*PAD, 2W).  One MXU matmul + 7 shifted adds.
        r = jnp.dot(p_padded.astype(t_ref.dtype), t_ref[...],
                    preferred_element_type=jnp.float32)           # (TH+6, 7W)
        acc = r[0:TH, 0:W]
        for kh in range(1, KERNEL):
            acc = acc + r[kh:kh + TH, kh * W:(kh + 1) * W]
        att = jax.nn.sigmoid(acc).astype(x.dtype)                 # (TH, W)
        o_ref[0] = x * att[None, :, :]

    if use_halo:
        def kernel(x_ref, xup_ref, xdn_ref, t_ref, o_ref):
            h = pl.program_id(1)
            x = x_ref[0]                                          # (C, TH, W)
            p_mid = plane_of(x)                                   # (TH, 2W)
            p_up = plane_of(xup_ref[0])                           # (HB, 2W)
            p_dn = plane_of(xdn_ref[0])                           # (HB, 2W)
            top = jnp.where(h > 0, p_up[-PAD:, :], 0.0)           # zero at image top
            bot = jnp.where(h < n_h - 1, p_dn[:PAD, :], 0.0)      # zero at image bottom
            conv_apply(jnp.concatenate([top, p_mid, bot], axis=0), t_ref, x, o_ref)
        return kernel

    def kernel(x_ref, t_ref, o_ref):
        x = x_ref[0]
        p_mid = plane_of(x)
        zpad = jnp.zeros((PAD, p_mid.shape[-1]), jnp.float32)
        conv_apply(jnp.concatenate([zpad, p_mid, zpad], axis=0), t_ref, x, o_ref)
    return kernel


# -----------------------------------------------------------------------------
# Block-size selection
# -----------------------------------------------------------------------------
def _choose_block_batch(N, per_batch_bytes, target_bytes):
    """Largest batch-block NB (divisor of N) fitting the per-step target.
    Tiny problems get a single fat step; otherwise keep >= 2 steps and bias NB
    toward multiples of 8 (f32 sublane / MXU M dim)."""
    if N * per_batch_bytes <= (1 << 20):
        return N
    best, best8 = 1, None
    for nb in range(1, N + 1):
        if N % nb:
            continue
        if nb * per_batch_bytes > target_bytes:
            break
        if N // nb >= 2:
            best = nb
            if nb % 8 == 0:
                best8 = nb
    return best8 if best8 is not None else best


def _choose_h_tile(H, per_row_bytes, block_target, row_g):
    """Largest H-tile (multiple of row_g, dividing H) whose x-slab fits the target."""
    if H % row_g != 0 or H * per_row_bytes <= block_target:
        # TODO(synk): pad H wrapper-side when H is huge but not a multiple of the
        # sublane granule, so such slabs can still be tiled on v7x's 64 MiB VMEM.
        return H
    best = row_g
    for t in range(row_g, H, row_g):
        if H % t == 0 and t * per_row_bytes <= block_target:
            best = t
    return best


# -----------------------------------------------------------------------------
# Wrapper
# -----------------------------------------------------------------------------
def _spatial_attention_flat(x, w, conv_dtype, target_block_bytes, cap):
    N, C, H, W = x.shape
    HW = H * W
    itemsize = jnp.dtype(x.dtype).itemsize
    t_mat = _build_full_conv_matrix(w, H, W, conv_dtype)          # (2*HW, HW)
    t_bytes = 2 * HW * HW * jnp.dtype(conv_dtype).itemsize
    x_in = x.reshape(N, C, HW)                                    # lane-dense view

    NB = _choose_block_batch(N, C * HW * itemsize, target_block_bytes)
    grid = (N // NB,)
    block_bytes = NB * C * HW * itemsize
    vmem_limit = _vmem_limit(4 * block_bytes + 2 * t_bytes + (4 << 20), cap)

    def run(single_buffer):
        return pl.pallas_call(
            _flat_kernel,
            out_shape=jax.ShapeDtypeStruct((N, C, HW), x.dtype),
            grid=grid,
            in_specs=[
                pl.BlockSpec((NB, C, HW), lambda n: (n, 0, 0)),
                _const_block_spec((2 * HW, HW), lambda n: (0, 0), single_buffer),
            ],
            out_specs=pl.BlockSpec((NB, C, HW), lambda n: (n, 0, 0)),
            compiler_params=pltpu.CompilerParams(
                dimension_semantics=("parallel",),
                vmem_limit_bytes=vmem_limit),
        )(x_in, t_mat)

    try:
        out = run(True)
    except Exception:   # Buffered(1) unsupported on this JAX/Mosaic -> default spec
        out = run(False)
    return out.reshape(N, C, H, W)


def _spatial_attention_banded(x, w, conv_dtype, h_block_rows, cap):
    N, C, H, W = x.shape
    itemsize = jnp.dtype(x.dtype).itemsize
    row_g = _row_granule(x.dtype)
    per_row_bytes = C * W * itemsize

    # H-tiling: per-step x slab targets ~cap/8 so in+out double buffers stay
    # well under half of VMEM while keeping the halo re-fetch fraction small.
    block_target = min(16 << 20, cap // 8)
    if h_block_rows is not None:
        TH = int(h_block_rows)
        if H % TH != 0 or (TH != H and TH % row_g != 0):
            TH = H
    else:
        TH = _choose_h_tile(H, per_row_bytes, block_target, row_g)
    n_h = H // TH
    use_halo = n_h > 1
    HB = row_g                                   # halo granule (sublane-aligned rows)
    thb = TH // HB if use_halo else 1
    n_hb = H // HB if use_halo else 1

    # TODO(synk): pad W (plane columns / t_cat / output tile) up to 128 when
    # 32 <= W < 128 for unmasked stores and full MXU columns (review item 9).
    t_cat = _build_banded_cat_matrix(w, W, conv_dtype)            # (2W, 7W)
    t_bytes = 2 * W * KERNEL * W * jnp.dtype(conv_dtype).itemsize

    x_block = C * TH * W * itemsize
    halo_block = (C * HB * W * itemsize) if use_halo else 0
    interm = (TH + 2 * PAD) * (KERNEL + 2) * W * 4
    vmem_limit = _vmem_limit(
        4 * x_block + 4 * halo_block + 2 * t_bytes + interm + (4 << 20), cap)

    kernel = _make_banded_kernel(TH, W, n_h, use_halo)
    grid = (N, n_h)
    x_spec = pl.BlockSpec((1, C, TH, W), lambda n, h: (n, 0, h, 0))
    out_spec = pl.BlockSpec((1, C, TH, W), lambda n, h: (n, 0, h, 0))

    def run(single_buffer):
        t_spec = _const_block_spec((2 * W, KERNEL * W), lambda n, h: (0, 0),
                                   single_buffer)
        if use_halo:
            up_spec = pl.BlockSpec(
                (1, C, HB, W),
                lambda n, h: (n, 0, jnp.maximum(h * thb - 1, 0), 0))
            dn_spec = pl.BlockSpec(
                (1, C, HB, W),
                lambda n, h: (n, 0, jnp.minimum((h + 1) * thb, n_hb - 1), 0))
            in_specs = [x_spec, up_spec, dn_spec, t_spec]
            operands = (x, x, x, t_cat)
        else:
            in_specs = [x_spec, t_spec]
            operands = (x, t_cat)
        return pl.pallas_call(
            kernel,
            out_shape=jax.ShapeDtypeStruct((N, C, H, W), x.dtype),
            grid=grid,
            in_specs=in_specs,
            out_specs=out_spec,
            compiler_params=pltpu.CompilerParams(
                dimension_semantics=("parallel", "parallel"),
                vmem_limit_bytes=vmem_limit),
        )(*operands)

    try:
        return run(True)
    except Exception:   # Buffered(1) unsupported -> default double-buffered spec
        return run(False)


def spatial_attention(x, w, *, h_block_rows=None, target_block_bytes=None):
    """x: (N, C, H, W); w: (1, 2, 7, 7) conv weight (no bias)."""
    N, C, H, W = x.shape
    HW = H * W
    cap = _vmem_capacity_bytes()

    # Generation-aware per-step target: ~2 MiB on 128 MiB parts (v5e/v6e),
    # ~1 MiB on v7x's 64 MiB (review item 4).
    if target_block_bytes is None:
        target_block_bytes = (2 << 20) if cap >= (100 << 20) else (1 << 20)

    # Conv-matrix dtype follows the activations: bf16 inputs take the MXU's
    # native bf16 path; f32 inputs keep f32 weights to hold tight tolerances.
    conv_dtype = jnp.bfloat16 if x.dtype == jnp.bfloat16 else jnp.float32
    conv_itemsize = jnp.dtype(conv_dtype).itemsize

    flat_matrix_budget = max(cap // 16, 4 << 20)   # 8 MiB on v5e/v6e, 4 MiB on v7x
    flat_matrix_bytes = 2 * HW * HW * conv_itemsize
    use_flat = (HW % 128 == 0) and (W < 128) and (flat_matrix_bytes <= flat_matrix_budget)

    if use_flat:
        return _spatial_attention_flat(x, w, conv_dtype, target_block_bytes, cap)
    return _spatial_attention_banded(x, w, conv_dtype, h_block_rows, cap)


def spatial_attention_reference(x, w):
    """Pure-JAX reference mirroring the PyTorch forward exactly."""
    x1 = jnp.mean(x, axis=1, keepdims=True)
    x2 = jnp.max(x, axis=1, keepdims=True)
    feats = jnp.concatenate([x1, x2], axis=1)
    conv = jax.lax.conv_general_dilated(
        feats, w, window_strides=(1, 1), padding=((PAD, PAD), (PAD, PAD)),
        dimension_numbers=("NCHW", "OIHW", "NCHW"))
    return x * jax.nn.sigmoid(conv)


if __name__ == "__main__":
    key = jax.random.PRNGKey(0)
    kx, kw, kx2 = jax.random.split(key, 3)

    # Primary check: small map -> lane-dense flat (single-matmul) path.
    N, C, H, W = 2, 4, 16, 16
    x = jax.random.normal(kx, (N, C, H, W), dtype=jnp.float32)
    fan_in = 2 * KERNEL * KERNEL
    w = jax.random.normal(kw, (1, 2, KERNEL, KERNEL), dtype=jnp.float32) / jnp.sqrt(fan_in)

    out = jax.block_until_ready(spatial_attention(x, w))
    ref = spatial_attention_reference(x, w)
    assert out.shape == (N, C, H, W)
    assert jnp.allclose(out, ref, atol=1e-3, rtol=1e-3), "flat path mismatch vs reference"

    # Secondary check: force the H-tiled banded path (2 H-tiles -> halo logic).
    x2 = jax.random.normal(kx2, (2, 8, 32, 128), dtype=jnp.float32)
    out2 = jax.block_until_ready(spatial_attention(x2, w, h_block_rows=16))
    ref2 = spatial_attention_reference(x2, w)
    assert out2.shape == x2.shape
    assert jnp.allclose(out2, ref2, atol=2e-3, rtol=2e-3), "banded path mismatch vs reference"

    print("KERNEL_OK")
</pallas_src>

<mosaic_0001>
module attributes {stable_mosaic.version = 11 : i64} {
  func.func @_flat_kernel(%arg0: i32, %arg1: memref<2x4x256xf32, #tpu.memory_space<vmem>>, %arg2: memref<512x256xf32, #tpu.memory_space<vmem>>, %arg3: memref<2x4x256xf32, #tpu.memory_space<vmem>>) attributes {dimension_semantics = [#tpu.dimension_semantics<parallel>], iteration_bounds = array<i64: 1>, scalar_prefetch = 0 : i64, scratch_operands = 0 : i64, tpu.core_type = #tpu.core_type<tc>, window_params = [{transform_indices = @transform_0, window_bounds = array<i64: 2, 4, 256>}, {pipeline_mode = #tpu.pipeline_mode<synchronous>, transform_indices = @transform_1, window_bounds = array<i64: 512, 256>}, {transform_indices = @transform_2, window_bounds = array<i64: 2, 4, 256>}]} {
    %c0 = arith.constant 0 : index
    %c0_0 = arith.constant 0 : index
    %c0_1 = arith.constant 0 : index
    %0 = vector.load %arg1[%c0, %c0_0, %c0_1] : memref<2x4x256xf32, #tpu.memory_space<vmem>>, vector<2x4x256xf32>
    %cst = arith.constant dense<0.000000e+00> : vector<2x256xf32>
    %1 = vector.multi_reduction <add>, %0, %cst [1] : vector<2x4x256xf32> to vector<2x256xf32>
    %cst_2 = arith.constant 4.000000e+00 : f32
    %2 = vector.broadcast %cst_2 : f32 to vector<2x256xf32>
    %3 = arith.divf %1, %2 : vector<2x256xf32>
    %cst_3 = arith.constant dense<0xFF800000> : vector<2x256xf32>
    %4 = vector.multi_reduction <maximumf>, %0, %cst_3 [1] : vector<2x4x256xf32> to vector<2x256xf32>
    %5 = tpu.concatenate %3, %4 in 1 : vector<2x256xf32>, vector<2x256xf32> -> vector<2x512xf32>
    %c0_4 = arith.constant 0 : index
    %c0_5 = arith.constant 0 : index
    %6 = vector.load %arg2[%c0_4, %c0_5] : memref<512x256xf32, #tpu.memory_space<vmem>>, vector<512x256xf32>
    %cst_6 = arith.constant dense<0.000000e+00> : vector<2x256xf32>
    %7 = tpu.matmul %5, %6, %cst_6 {dimension_numbers = #tpu.dot_dimension_numbers<[1], [0], [0], [1], [0, 0, 1, 1], [], []>} : vector<2x512xf32>, vector<512x256xf32>, vector<2x256xf32> -> vector<2x256xf32>
    %8 = arith.negf %7 : vector<2x256xf32>
    %9 = math.exp %8 : vector<2x256xf32>
    %cst_7 = arith.constant 1.000000e+00 : f32
    %10 = vector.broadcast %cst_7 : f32 to vector<2x256xf32>
    %11 = arith.addf %10, %9 : vector<2x256xf32>
    %12 = arith.divf %10, %11 : vector<2x256xf32>
    %13 = vector.shape_cast %12 : vector<2x256xf32> to vector<2x1x256xf32>
    %14 = vector.broadcast %13 : vector<2x1x256xf32> to vector<2x4x256xf32>
    %15 = arith.mulf %0, %14 : vector<2x4x256xf32>
    %c0_8 = arith.constant 0 : index
    %c0_9 = arith.constant 0 : index
    %c0_10 = arith.constant 0 : index
    %16 = vector.load %arg3[%c0_8, %c0_9, %c0_10] : memref<2x4x256xf32, #tpu.memory_space<vmem>>, vector<2x4x256xf32>
    tpu.vector_store %arg3[%c0_8, %c0_9, %c0_10], %15 {strides = array<i32>} : memref<2x4x256xf32, #tpu.memory_space<vmem>>, vector<2x4x256xf32>,
    return
  }
  func.func @transform_0(%arg0: i32) -> (i32, i32, i32) {
    %c0_i32 = arith.constant 0 : i32
    %c0_i32_0 = arith.constant 0 : i32
    %c0_i32_1 = arith.constant 0 : i32
    return %arg0, %c0_i32, %c0_i32_0 : i32, i32, i32
  }
  func.func @transform_1(%arg0: i32) -> (i32, i32) {
    %c0_i32 = arith.constant 0 : i32
    %c0_i32_0 = arith.constant 0 : i32
    %c0_i32_1 = arith.constant 0 : i32
    return %c0_i32, %c0_i32_0 : i32, i32
  }
  func.func @transform_2(%arg0: i32) -> (i32, i32, i32) {
    %c0_i32 = arith.constant 0 : i32
    %c0_i32_0 = arith.constant 0 : i32
    %c0_i32_1 = arith.constant 0 : i32
    return %arg0, %c0_i32, %c0_i32_0 : i32, i32, i32
  }
}

module attributes {stable_mosaic.version = 11 : i64} {
  func.func @_flat_kernel(%arg0: i32, %arg1: memref<2x4x256xf32, #tpu.memory_space<vmem>>, %arg2: memref<512x256xf32, #tpu.memory_space<vmem>>, %arg3: memref<2x4x256xf32, #tpu.memory_space<vmem>>) attributes {dimension_semantics = [#tpu.dimension_semantics<parallel>], iteration_bounds = array<i64: 1>, scalar_prefetch = 0 : i64, scratch_operands = 0 : i64, tpu.core_type = #tpu.core_type<tc>, window_params = [{transform_indices = @transform_0, window_bounds = array<i64: 2, 4, 256>}, {pipeline_mode = #tpu.pipeline_mode<synchronous>, transform_indices = @transform_1, window_bounds = array<i64: 512, 256>}, {transform_indices = @transform_2, window_bounds = array<i64: 2, 4, 256>}]} {
    %c0 = arith.constant 0 : index
    %c0_0 = arith.constant 0 : index
    %c0_1 = arith.constant 0 : index
    %0 = vector.load %arg1[%c0, %c0_0, %c0_1] : memref<2x4x256xf32, #tpu.memory_space<vmem>>, vector<2x4x256xf32>
    %cst = arith.constant dense<0.000000e+00> : vector<2x256xf32>
    %1 = vector.multi_reduction <add>, %0, %cst [1] : vector<2x4x256xf32> to vector<2x256xf32>
    %cst_2 = arith.constant 4.000000e+00 : f32
    %2 = vector.broadcast %cst_2 : f32 to vector<2x256xf32>
    %3 = arith.divf %1, %2 : vector<2x256xf32>
    %cst_3 = arith.constant dense<0xFF800000> : vector<2x256xf32>
    %4 = vector.multi_reduction <maximumf>, %0, %cst_3 [1] : vector<2x4x256xf32> to vector<2x256xf32>
    %5 = tpu.concatenate %3, %4 in 1 : vector<2x256xf32>, vector<2x256xf32> -> vector<2x512xf32>
    %c0_4 = arith.constant 0 : index
    %c0_5 = arith.constant 0 : index
    %6 = vector.load %arg2[%c0_4, %c0_5] : memref<512x256xf32, #tpu.memory_space<vmem>>, vector<512x256xf32>
    %cst_6 = arith.constant dense<0.000000e+00> : vector<2x256xf32>
    %7 = tpu.matmul %5, %6, %cst_6 {dimension_numbers = #tpu.dot_dimension_numbers<[1], [0], [0], [1], [0, 0, 1, 1], [], []>} : vector<2x512xf32>, vector<512x256xf32>, vector<2x256xf32> -> vector<2x256xf32>
    %8 = arith.negf %7 : vector<2x256xf32>
    %9 = math.exp %8 : vector<2x256xf32>
    %cst_7 = arith.constant 1.000000e+00 : f32
    %10 = vector.broadcast %cst_7 : f32 to vector<2x256xf32>
    %11 = arith.addf %10, %9 : vector<2x256xf32>
    %12 = arith.divf %10, %11 : vector<2x256xf32>
    %13 = vector.shape_cast %12 : vector<2x256xf32> to vector<2x1x256xf32>
    %14 = vector.broadcast %13 : vector<2x1x256xf32> to vector<2x4x256xf32>
    %15 = arith.mulf %0, %14 : vector<2x4x256xf32>
    %c0_8 = arith.constant 0 : index
    %c0_9 = arith.constant 0 : index
    %c0_10 = arith.constant 0 : index
    %16 = vector.load %arg3[%c0_8, %c0_9, %c0_10] : memref<2x4x256xf32, #tpu.memory_space<vmem>>, vector<2x4x256xf32>
    tpu.vector_store %arg3[%c0_8, %c0_9, %c0_10], %15 {strides = array<i32>} : memref<2x4x256xf32, #tpu.memory_space<vmem>>, vector<2x4x256xf32>,
    return
  }
  func.func @transform_0(%arg0: i32) -> (i32, i32, i32) {
    %c0_i32 = arith.constant 0 : i32
    %c0_i32_0 = arith.constant 0 : i32
    %c0_i32_1 = arith.constant 0 : i32
    return %arg0, %c0_i32, %c0_i32_0 : i32, i32, i32
  }
  func.func @transform_1(%arg0: i32) -> (i32, i32) {
    %c0_i32 = arith.constant 0 : i32
    %c0_i32_0 = arith.constant 0 : i32
    %c0_i32_1 = arith.constant 0 : i32
    return %c0_i32, %c0_i32_0 : i32, i32
  }
  func.func @transform_2(%arg0: i32) -> (i32, i32, i32) {
    %c0_i32 = arith.constant 0 : i32
    %c0_i32_0 = arith.constant 0 : i32
    %c0_i32_1 = arith.constant 0 : i32
    return %arg0, %c0_i32, %c0_i32_0 : i32, i32, i32
  }
}

</mosaic_0001>

<bundles_post_ra>
// kernel: tpu_custom_call.1
= control target key start
LH: loop header
LB: loop body
LE: loop exit
PB: predicated region body
PF: predicated region fallthrough
CT: control target
= control target key end

     0   :  { %7 = vsyncpa [#allocation3], 0  ;;  %s696_s0 = inlined_call_operand.hbm [shape: f32[2,4,256], index: 0, kind: input, shape index: {}]   ;;  %s697_s1 = inlined_call_operand.hbm [shape: f32[512,256], index: 1, kind: input, shape index: {}]   ;;  %s698_s2 = inlined_call_operand.hbm [shape: f32[2,4,256], index: 2, kind: output, shape index: {}]  }
   0x1   :  { %8 = vsyncpa [#allocation6], 0 }
   0x2   :  { %9 = vsyncpa [#allocation4], 0  ;;  %s14_s11 = sshll.u32 %s696_s0, 4  ;;  %s620_s12 = smov [#allocation2]   ;;  %s15_s11 = int_to_ptr.hbm [resolvable:$true] %s14_s11 }
   0x3   :  { %s16_s13 = sshll.u32 %s620_s12, 4  ;;  %s27_s16 = sshll.u32 %s697_s1, 4  ;;  %s17_s13 = int_to_ptr.vmem [resolvable:$true] %s16_s13  ;;  %s28_s16 = int_to_ptr.hbm [resolvable:$true] %s27_s16 }
   0x4   :  { %s621_s17 = smov 128   ;;  %s622_s18 = smov 8  }
   0x5   :  { %22 = dma.hbm_to_vmem [thread:$0]  %s15_s11, 256, %s17_s13, [#allocation3], %s621_s17, %s621_s17, %s622_s18  }
   0x6   :  { %s623_s19 = smov [#allocation5]   ;;  %s624_s21 = smov 256  }
   0x7   :  { %s29_s20 = sshll.u32 %s623_s19, 4  ;;  %s625_s0 = smov 16   ;;  %s30_s20 = int_to_ptr.vmem [resolvable:$true] %s29_s20 }
   0x8   :  { %35 = dma.hbm_to_vmem [thread:$0]  %s28_s16, 16384, %s30_s20, [#allocation6], %s624_s21, %s624_s21, %s625_s0  }
   0x9   :  { %614 = dma.done.wait [#allocation3], 256  }
   0xa   :  { %615 = vsyncadd [#allocation3], 4294967040 }
   0xb   :  { %616 = dma.done.wait [#allocation6], 16384  }
   0xc   :  { %617 = vsyncadd [#allocation6], 4294950912  ;;  %v249_v0 = vld [vmem:[#allocation5 + $0x2f0] sm:$0xff]  ;;  %v247_v1 = vld [vmem:[#allocation5 + $0x2e0] sm:$0xff]  ;;  %v626_v42 = vmov 4.0   ;;  %vm59_vm0 = vcmask 1043456  }
   0xd   :  { %v281_v2 = vld [vmem:[#allocation5 + $0x3f0] sm:$0xff]  ;;  %323 = vmatpush.msra.mxu2 %v249_v0  ;;  %v279_v6 = vld [vmem:[#allocation5 + $0x3e0] sm:$0xff]  ;;  %532 = vrcp.f32 %v626_v42  ;;  %v656_v61 = vld [vmem:[#allocation2 + $0x8] sm:$0xff]  ;;  %vm142_vm2 = vcmask 1041409   ;;  %vm484_vm11 = vcmask 1040384   ;;  %s627_s1 = smov [#allocation7]  }
   0xe   :  { %343 = vmatpush.msra.mxu3 %v281_v2  ;;  %v185_v3 = vld [vmem:[#allocation5 + $0xf0] sm:$0xff]  ;;  %v183_v7 = vld [vmem:[#allocation5 + $0xe0] sm:$0xff]  ;;  %52 = vst [vmem:[#allocation1 + $0x10] ss:$2 sm:$0xff] %v656_v61  ;;  %s506_s22 = sshll.u32 %s627_s1, 4  ;;  %s508_s25 = sshll.u32 %s698_s2, 4  ;;  %s507_s22 = int_to_ptr.vmem [resolvable:$true] %s506_s22  ;;  %s509_s25 = int_to_ptr.hbm [resolvable:$true] %s508_s25 }
   0xf   :  { %v217_v4 = vld [vmem:[#allocation5 + $0x1f0] sm:$0xff]  ;;  %283 = vmatpush.msra.mxu0 %v185_v3  ;;  %v215_v8 = vld [vmem:[#allocation5 + $0x1e0] sm:$0xff]  ;;  %324 = vmatpush.msra.mxu2 %v247_v1  ;;  %v250_v3 = vld [vmem:[#allocation5 + $0x2f8] sm:$0xff] }
  0x10   :  { %v245_v5 = vld [vmem:[#allocation5 + $0x2d0] sm:$0xff]  ;;  %303 = vmatpush.msra.mxu1 %v217_v4  ;;  %344 = vmatpush.msra.mxu3 %v279_v6  ;;  %v243_v11 = vld [vmem:[#allocation5 + $0x2c0] sm:$0xff]  ;;  %v282_v4 = vld [vmem:[#allocation5 + $0x3f8] sm:$0xff] }
  0x11   :  { %v277_v9 = vld [vmem:[#allocation5 + $0x3d0] sm:$0xff]  ;;  %284 = vmatpush.msra.mxu0 %v183_v7  ;;  %v275_v13 = vld [vmem:[#allocation5 + $0x3c0] sm:$0xff]  ;;  %325 = vmatpush.msra.mxu2 %v245_v5  ;;  %v248_v5 = vld [vmem:[#allocation5 + $0x2e8] sm:$0xff] }
  0x12   :  { %v181_v10 = vld [vmem:[#allocation5 + $0xd0] sm:$0xff]  ;;  %304 = vmatpush.msra.mxu1 %v215_v8  ;;  %345 = vmatpush.msra.mxu3 %v277_v9  ;;  %v179_v14 = vld [vmem:[#allocation5 + $0xc0] sm:$0xff]  ;;  %v186_v8 = vld [vmem:[#allocation5 + $0xf8] sm:$0xff] }
  0x13   :  { %v213_v12 = vld [vmem:[#allocation5 + $0x1d0] sm:$0xff]  ;;  %v211_v15 = vld [vmem:[#allocation5 + $0x1c0] sm:$0xff]  ;;  %285 = vmatpush.msra.mxu0 %v181_v10  ;;  %326 = vmatpush.msra.mxu2 %v243_v11  ;;  %v652_v53 = vpop.eup %532  ;;  %v218_v9 = vld [vmem:[#allocation5 + $0x1f8] sm:$0xff] }
  0x14   :  { %305 = vmatpush.msra.mxu1 %v213_v12  ;;  %v241_v16 = vld [vmem:[#allocation5 + $0x2b0] sm:$0xff]  ;;  %346 = vmatpush.msra.mxu3 %v275_v13  ;;  %v239_v20 = vld [vmem:[#allocation5 + $0x2a0] sm:$0xff]  ;;  %v89_v0 = vmul.f32 4.0, %v652_v53  ;;  %v246_v10 = vld [vmem:[#allocation5 + $0x2d8] sm:$0xff]  ;;  %vm93_vm1 = vweird.f32 %v652_v53 }
  0x15   :  { %v273_v17 = vld [vmem:[#allocation5 + $0x3b0] sm:$0xff]  ;;  %286 = vmatpush.msra.mxu0 %v179_v14  ;;  %v271_v21 = vld [vmem:[#allocation5 + $0x3a0] sm:$0xff]  ;;  %327 = vmatpush.msra.mxu2 %v241_v16  ;;  %v280_v12 = vld [vmem:[#allocation5 + $0x3e8] sm:$0xff] }
  0x16   :  { %v177_v18 = vld [vmem:[#allocation5 + $0xb0] sm:$0xff]  ;;  %306 = vmatpush.msra.mxu1 %v211_v15  ;;  %347 = vmatpush.msra.mxu3 %v273_v17  ;;  %v175_v22 = vld [vmem:[#allocation5 + $0xa0] sm:$0xff]  ;;  %v90_v11 = vsub.f32 1.0, %v89_v0  ;;  %v184_v13 = vld [vmem:[#allocation5 + $0xe8] sm:$0xff] }
  0x17   :  { %v209_v19 = vld [vmem:[#allocation5 + $0x1b0] sm:$0xff]  ;;  %v207_v23 = vld [vmem:[#allocation5 + $0x1a0] sm:$0xff]  ;;  %287 = vmatpush.msra.mxu0 %v177_v18  ;;  %328 = vmatpush.msra.mxu2 %v239_v20  ;;  %v216_v14 = vld [vmem:[#allocation5 + $0x1e8] sm:$0xff] }
  0x18   :  { %307 = vmatpush.msra.mxu1 %v209_v19  ;;  %v237_v24 = vld [vmem:[#allocation5 + $0x290] sm:$0xff]  ;;  %348 = vmatpush.msra.mxu3 %v271_v21  ;;  %v235_v28 = vld [vmem:[#allocation5 + $0x280] sm:$0xff]  ;;  %v244_v15 = vld [vmem:[#allocation5 + $0x2c8] sm:$0xff] }
  0x19   :  { %v269_v25 = vld [vmem:[#allocation5 + $0x390] sm:$0xff]  ;;  %288 = vmatpush.msra.mxu0 %v175_v22  ;;  %v267_v29 = vld [vmem:[#allocation5 + $0x380] sm:$0xff]  ;;  %329 = vmatpush.msra.mxu2 %v237_v24  ;;  %v278_v16 = vld [vmem:[#allocation5 + $0x3d8] sm:$0xff] }
  0x1a   :  { %v173_v26 = vld [vmem:[#allocation5 + $0x90] sm:$0xff]  ;;  %308 = vmatpush.msra.mxu1 %v207_v23  ;;  %349 = vmatpush.msra.mxu3 %v269_v25  ;;  %v171_v30 = vld [vmem:[#allocation5 + $0x80] sm:$0xff]  ;;  %v182_v17 = vld [vmem:[#allocation5 + $0xd8] sm:$0xff] }
  0x1b   :  { %v205_v27 = vld [vmem:[#allocation5 + $0x190] sm:$0xff]  ;;  %v203_v31 = vld [vmem:[#allocation5 + $0x180] sm:$0xff]  ;;  %289 = vmatpush.msra.mxu0 %v173_v26  ;;  %330 = vmatpush.msra.mxu2 %v235_v28  ;;  %v214_v18 = vld [vmem:[#allocation5 + $0x1d8] sm:$0xff]  ;;  %v91_v26 = vmul.f32 %v652_v53, %v90_v11 }
  0x1c   :  { %309 = vmatpush.msra.mxu1 %v205_v27  ;;  %v233_v32 = vld [vmem:[#allocation5 + $0x270] sm:$0xff]  ;;  %350 = vmatpush.msra.mxu3 %v267_v29  ;;  %v231_v36 = vld [vmem:[#allocation5 + $0x260] sm:$0xff]  ;;  %v276_v19 = vld [vmem:[#allocation5 + $0x3c8] sm:$0xff] }
  0x1d   :  { %v265_v33 = vld [vmem:[#allocation5 + $0x370] sm:$0xff]  ;;  %290 = vmatpush.msra.mxu0 %v171_v30  ;;  %v263_v37 = vld [vmem:[#allocation5 + $0x360] sm:$0xff]  ;;  %331 = vmatpush.msra.mxu2 %v233_v32  ;;  %v242_v22 = vld [vmem:[#allocation5 + $0x2b8] sm:$0xff] }
  0x1e   :  { %v169_v34 = vld [vmem:[#allocation5 + $0x70] sm:$0xff]  ;;  %310 = vmatpush.msra.mxu1 %v203_v31  ;;  %351 = vmatpush.msra.mxu3 %v265_v33  ;;  %v167_v38 = vld [vmem:[#allocation5 + $0x60] sm:$0xff]  ;;  %v53_v23 = vld.sshfl [vmem:[#allocation1 + $0x10] sm:$0xff pattern:$0x75316420] }
  0x1f   :  { %v201_v35 = vld [vmem:[#allocation5 + $0x170] sm:$0xff]  ;;  %v199_v39 = vld [vmem:[#allocation5 + $0x160] sm:$0xff]  ;;  %291 = vmatpush.msra.mxu0 %v169_v34  ;;  %332 = vmatpush.msra.mxu2 %v231_v36  ;;  %v180_v25 = vld [vmem:[#allocation5 + $0xc8] sm:$0xff]  ;;  %v74_v28 = vsel %vm59_vm0, %v53_v23, 0.0 }
  0x20   :  { %311 = vmatpush.msra.mxu1 %v201_v35  ;;  %v229_v40 = vld [vmem:[#allocation5 + $0x250] sm:$0xff]  ;;  %352 = vmatpush.msra.mxu3 %v263_v37  ;;  %v227_v45 = vld [vmem:[#allocation5 + $0x240] sm:$0xff]  ;;  %v75_v32 = vrot.slane %v74_v28, 4  ;;  %v212_v35 = vld [vmem:[#allocation5 + $0x1c8] sm:$0xff] }
  0x21   :  { %v261_v41 = vld [vmem:[#allocation5 + $0x350] sm:$0xff]  ;;  %292 = vmatpush.msra.mxu0 %v167_v38  ;;  %v259_v46 = vld [vmem:[#allocation5 + $0x340] sm:$0xff]  ;;  %333 = vmatpush.msra.mxu2 %v229_v40  ;;  %v274_v36 = vld [vmem:[#allocation5 + $0x3b8] sm:$0xff] }
  0x22   :  { %v165_v43 = vld [vmem:[#allocation5 + $0x50] sm:$0xff]  ;;  %312 = vmatpush.msra.mxu1 %v199_v39  ;;  %353 = vmatpush.msra.mxu3 %v261_v41  ;;  %v163_v47 = vld [vmem:[#allocation5 + $0x40] sm:$0xff]  ;;  %v240_v37 = vld [vmem:[#allocation5 + $0x2a8] sm:$0xff]  ;;  %v76_v41 = vadd.f32 %v75_v32, %v74_v28 }
  0x23   :  { %v197_v44 = vld [vmem:[#allocation5 + $0x150] sm:$0xff]  ;;  %v195_v48 = vld [vmem:[#allocation5 + $0x140] sm:$0xff]  ;;  %293 = vmatpush.msra.mxu0 %v165_v43  ;;  %334 = vmatpush.msra.mxu2 %v227_v45  ;;  %v178_v38 = vld [vmem:[#allocation5 + $0xb8] sm:$0xff] }
  0x24   :  { %313 = vmatpush.msra.mxu1 %v197_v44  ;;  %v225_v49 = vld [vmem:[#allocation5 + $0x230] sm:$0xff]  ;;  %354 = vmatpush.msra.mxu3 %v259_v46  ;;  %v223_v54 = vld [vmem:[#allocation5 + $0x220] sm:$0xff]  ;;  %v210_v39 = vld [vmem:[#allocation5 + $0x1b8] sm:$0xff] }
  0x25   :  { %v257_v50 = vld [vmem:[#allocation5 + $0x330] sm:$0xff]  ;;  %294 = vmatpush.msra.mxu0 %v163_v47  ;;  %v255_v55 = vld [vmem:[#allocation5 + $0x320] sm:$0xff]  ;;  %335 = vmatpush.msra.mxu2 %v225_v49  ;;  %v238_v43 = vld [vmem:[#allocation5 + $0x298] sm:$0xff]  ;;  %v92_v49 = vadd.f32 %v652_v53, %v91_v26 }
  0x26   :  { %v161_v51 = vld [vmem:[#allocation5 + $0x30] sm:$0xff]  ;;  %314 = vmatpush.msra.mxu1 %v195_v48  ;;  %355 = vmatpush.msra.mxu3 %v257_v50  ;;  %v159_v57 = vld [vmem:[#allocation5 + $0x20] sm:$0xff]  ;;  %v272_v44 = vld [vmem:[#allocation5 + $0x3a8] sm:$0xff]  ;;  %v77_v48 = vrot.slane %v76_v41, 2 }
  0x27   :  { %v193_v52 = vld [vmem:[#allocation5 + $0x130] sm:$0xff]  ;;  %v191_v58 = vld [vmem:[#allocation5 + $0x120] sm:$0xff]  ;;  %295 = vmatpush.msra.mxu0 %v161_v51  ;;  %336 = vmatpush.msra.mxu2 %v223_v54  ;;  %v176_v46 = vld [vmem:[#allocation5 + $0xa8] sm:$0xff] }
  0x28   :  { %v221_v56 = vld [vmem:[#allocation5 + $0x210] sm:$0xff]  ;;  %315 = vmatpush.msra.mxu1 %v193_v52  ;;  %356 = vmatpush.msra.mxu3 %v255_v55  ;;  %v219_v1 = vld [vmem:[#allocation5 + $0x200] sm:$0xff]  ;;  %v208_v51 = vld [vmem:[#allocation5 + $0x1a8] sm:$0xff]  ;;  %v78_v0 = vadd.f32 %v77_v48, %v76_v41 }
  0x29   :  { %v253_v59 = vld [vmem:[#allocation5 + $0x310] sm:$0xff]  ;;  %296 = vmatpush.msra.mxu0 %v159_v57  ;;  %v251_v2 = vld [vmem:[#allocation5 + $0x300] sm:$0xff]  ;;  %337 = vmatpush.msra.mxu2 %v221_v56  ;;  %v236_v52 = vld [vmem:[#allocation5 + $0x288] sm:$0xff] }
  0x2a   :  { %v654_v60 = vld [vmem:[#allocation2] sm:$0xff]  ;;  %316 = vmatpush.msra.mxu1 %v191_v58  ;;  %357 = vmatpush.msra.mxu3 %v253_v59  ;;  %v155_v6 = vld [vmem:[#allocation5] sm:$0xff]  ;;  %v270_v54 = vld [vmem:[#allocation5 + $0x398] sm:$0xff] }
  0x2b   :  { %v157_v62 = vld [vmem:[#allocation5 + $0x10] sm:$0xff]  ;;  %48 = vst [vmem:[#allocation1] ss:$2 sm:$0xff] %v654_v60  ;;  %v187_v7 = vld [vmem:[#allocation5 + $0x100] sm:$0xff]  ;;  %338 = vmatpush.msra.mxu2 %v219_v1  ;;  %v174_v56 = vld [vmem:[#allocation5 + $0x98] sm:$0xff] }
  0x2c   :  { %v189_v63 = vld [vmem:[#allocation5 + $0x110] sm:$0xff]  ;;  %297 = vmatpush.msra.mxu0 %v157_v62  ;;  %358 = vmatpush.msra.mxu3 %v251_v2  ;;  %v54_v24 = vld.sshfl [vmem:[#allocation1 + $0x18] sm:$0xff pattern:$0x75316420]  ;;  %v206_v57 = vld [vmem:[#allocation5 + $0x198] sm:$0xff] }
  0x2d   :  { %317 = vmatpush.msra.mxu1 %v189_v63  ;;  %403 = vmatpush.msrb.mxu2 %v250_v3  ;;  %v81_v30 = vsel %vm59_vm0, %v54_v24, 0.0  ;;  %103 = vst [vmem:[#allocation1 + $0x10] ss:$2 sm:$0xff] %v656_v61  ;;  %v268_v58 = vld [vmem:[#allocation5 + $0x388] sm:$0xff]  ;;  %v234_v2 = vld [vmem:[#allocation5 + $0x278] sm:$0xff] }
  0x2e   :  { %423 = vmatpush.msrb.mxu3 %v282_v4  ;;  %298 = vmatpush.msra.mxu0 %v155_v6  ;;  %v82_v34 = vrot.slane %v81_v30, 4  ;;  %v232_v23 = vld [vmem:[#allocation5 + $0x268] sm:$0xff]  ;;  %v170_v24 = vld [vmem:[#allocation5 + $0x78] sm:$0xff] }
  0x2f   :  { %318 = vmatpush.msra.mxu1 %v187_v7  ;;  %404 = vmatpush.msrb.mxu2 %v248_v5  ;;  %v172_v7 = vld [vmem:[#allocation5 + $0x88] sm:$0xff]  ;;  %v202_v28 = vld [vmem:[#allocation5 + $0x178] sm:$0xff] }
  0x30   :  { %363 = vmatpush.msrb.mxu0 %v186_v8  ;;  %424 = vmatpush.msrb.mxu3 %v280_v12  ;;  %v83_v45 = vadd.f32 %v82_v34, %v81_v30  ;;  %v94_v12 = vsel %vm93_vm1, %v652_v53, %v92_v49  ;;  %v230_v34 = vld [vmem:[#allocation5 + $0x258] sm:$0xff] }
  0x31   :  { %383 = vmatpush.msrb.mxu1 %v218_v9  ;;  %405 = vmatpush.msrb.mxu2 %v246_v10 }
  0x32   :  { %v49_v20 = vld.sshfl [vmem:[#allocation1] sm:$0xff pattern:$0x75316420]  ;;  %v50_v21 = vld.sshfl [vmem:[#allocation1 + $0x8] sm:$0xff pattern:$0x75316420]  ;;  %364 = vmatpush.msrb.mxu0 %v184_v13  ;;  %425 = vmatpush.msrb.mxu3 %v278_v16 }
  0x33   :  { %99 = vst [vmem:[#allocation1] ss:$2 sm:$0xff] %v654_v60  ;;  %v60_v27 = vsel %vm59_vm0, %v49_v20, 0.0  ;;  %v67_v29 = vsel %vm59_vm0, %v50_v21, 0.0  ;;  %384 = vmatpush.msrb.mxu1 %v216_v14  ;;  %406 = vmatpush.msrb.mxu2 %v244_v15  ;;  %v84_v55 = vrot.slane %v83_v45, 2  ;;  %v79_v16 = vrot.slane %v78_v0, 1 }
  0x34   :  { %v61_v31 = vrot.slane %v60_v27, 4  ;;  %v68_v33 = vrot.slane %v67_v29, 4  ;;  %365 = vmatpush.msrb.mxu0 %v182_v17  ;;  %426 = vmatpush.msrb.mxu3 %v276_v19  ;;  %v104_v3 = vld.sshfl [vmem:[#allocation1 + $0x10] sm:$0xff pattern:$0x75316420]  ;;  %v204_v17 = vld [vmem:[#allocation5 + $0x188] sm:$0xff] }
  0x35   :  { %385 = vmatpush.msrb.mxu1 %v214_v18  ;;  %407 = vmatpush.msrb.mxu2 %v242_v22  ;;  %v85_v6 = vadd.f32 %v84_v55, %v83_v45  ;;  %v124_v9 = vsel %vm59_vm0, %v104_v3, -inf  ;;  %v105_v10 = vld.sshfl [vmem:[#allocation1 + $0x18] sm:$0xff pattern:$0x75316420]  ;;  %v266_v18 = vld [vmem:[#allocation5 + $0x378] sm:$0xff]  ;;  %v80_v26 = vadd.f32 %v79_v16, %v78_v0  ;;  %v228_v45 = vld [vmem:[#allocation5 + $0x248] sm:$0xff] }
  0x36   :  { %v62_v40 = vadd.f32 %v61_v31, %v60_v27  ;;  %v69_v42 = vadd.f32 %v68_v33, %v67_v29  ;;  %366 = vmatpush.msrb.mxu0 %v180_v25  ;;  %427 = vmatpush.msrb.mxu3 %v274_v36  ;;  %v125_v13 = vrot.slane %v124_v9, 4  ;;  %v131_v14 = vsel %vm59_vm0, %v105_v10, -inf  ;;  %v264_v29 = vld [vmem:[#allocation5 + $0x368] sm:$0xff]  ;;  %v198_v55 = vld [vmem:[#allocation5 + $0x158] sm:$0xff] }
  0x37   :  { %386 = vmatpush.msrb.mxu1 %v212_v35  ;;  %408 = vmatpush.msrb.mxu2 %v240_v37  ;;  %v132_v21 = vrot.slane %v131_v14, 4  ;;  %v86_v27 = vrot.slane %v85_v6, 1  ;;  %v168_v35 = vld [vmem:[#allocation5 + $0x68] sm:$0xff]  ;;  %v222_v10 = vld [vmem:[#allocation5 + $0x218] sm:$0xff] }
  0x38   :  { %v63_v47 = vrot.slane %v62_v40, 2  ;;  %v70_v50 = vrot.slane %v69_v42, 2  ;;  %367 = vmatpush.msrb.mxu0 %v178_v38  ;;  %428 = vmatpush.msrb.mxu3 %v272_v44  ;;  %v126_v53 = vmax.f32 %v124_v9, %v125_v13  ;;  %v97_v38 = vmul.f32 %v94_v12, %v80_v26  ;;  %v224_v3 = vld [vmem:[#allocation5 + $0x228] sm:$0xff]  ;;  %v194_v9 = vld [vmem:[#allocation5 + $0x138] sm:$0xff] }
  0x39   :  { %387 = vmatpush.msrb.mxu1 %v210_v39  ;;  %409 = vmatpush.msrb.mxu2 %v238_v43  ;;  %v133_v32 = vmax.f32 %v131_v14, %v132_v21  ;;  %v87_v39 = vadd.f32 %v86_v27, %v85_v6  ;;  %v160_v13 = vld [vmem:[#allocation5 + $0x28] sm:$0xff]  ;;  %v254_v16 = vld [vmem:[#allocation5 + $0x318] sm:$0xff] }
  0x3a   :  { %v100_v59 = vld.sshfl [vmem:[#allocation1] sm:$0xff pattern:$0x75316420]  ;;  %v101_v62 = vld.sshfl [vmem:[#allocation1 + $0x8] sm:$0xff pattern:$0x75316420]  ;;  %v64_v63 = vadd.f32 %v63_v47, %v62_v40  ;;  %v71_v1 = vadd.f32 %v70_v50, %v69_v42  ;;  %368 = vmatpush.msrb.mxu0 %v176_v46  ;;  %429 = vmatpush.msrb.mxu3 %v270_v54 }
  0x3b   :  { %v110_v4 = vsel %vm59_vm0, %v100_v59, -inf  ;;  %v117_v5 = vsel %vm59_vm0, %v101_v62, -inf  ;;  %388 = vmatpush.msrb.mxu1 %v208_v51  ;;  %410 = vmatpush.msrb.mxu2 %v236_v52  ;;  %v127_v36 = vrot.slane %v126_v53, 2  ;;  %v200_v40 = vld [vmem:[#allocation5 + $0x168] sm:$0xff]  ;;  %v134_v43 = vrot.slane %v133_v32, 2  ;;  %v262_v46 = vld [vmem:[#allocation5 + $0x358] sm:$0xff] }
  0x3c   :  { %v111_v8 = vrot.slane %v110_v4, 4  ;;  %v118_v11 = vrot.slane %v117_v5, 4  ;;  %v65_v15 = vrot.slane %v64_v63, 1  ;;  %369 = vmatpush.msrb.mxu0 %v174_v56  ;;  %v72_v22 = vrot.slane %v71_v1, 1  ;;  %430 = vmatpush.msrb.mxu3 %v268_v58  ;;  %v166_v50 = vld [vmem:[#allocation5 + $0x58] sm:$0xff]  ;;  %v260_v59 = vld [vmem:[#allocation5 + $0x348] sm:$0xff] }
  0x3d   :  { %389 = vmatpush.msrb.mxu1 %v206_v57  ;;  %411 = vmatpush.msrb.mxu2 %v234_v2  ;;  %v128_v47 = vmax.f32 %v126_v53, %v127_v36  ;;  %v98_v49 = vmul.f32 %v94_v12, %v87_v39  ;;  %v135_v54 = vmax.f32 %v133_v32, %v134_v43  ;;  %v226_v56 = vld [vmem:[#allocation5 + $0x238] sm:$0xff]  ;;  %v164_v62 = vld [vmem:[#allocation5 + $0x48] sm:$0xff] }
  0x3e   :  { %v112_v19 = vmax.f32 %v110_v4, %v111_v8  ;;  %v119_v20 = vmax.f32 %v117_v5, %v118_v11  ;;  %v66_v25 = vadd.f32 %v65_v15, %v64_v63  ;;  %370 = vmatpush.msrb.mxu0 %v172_v7  ;;  %v73_v33 = vadd.f32 %v72_v22, %v71_v1  ;;  %v196_v2 = vld [vmem:[#allocation5 + $0x148] sm:$0xff]  ;;  %v258_v5 = vld [vmem:[#allocation5 + $0x338] sm:$0xff] }
  0x3f   :  { %390 = vmatpush.msrb.mxu1 %v204_v17  ;;  %431 = vmatpush.msrb.mxu3 %v266_v18  ;;  %v129_v57 = vrot.slane %v128_v47, 1  ;;  %v136_v1 = vrot.slane %v135_v54, 1  ;;  %v162_v7 = vld [vmem:[#allocation5 + $0x38] sm:$0xff]  ;;  %v192_v14 = vld [vmem:[#allocation5 + $0x128] sm:$0xff] }
  0x40   :  { %v113_v30 = vrot.slane %v112_v19, 2  ;;  %v120_v31 = vrot.slane %v119_v20, 2  ;;  %v95_v37 = vmul.f32 %v94_v12, %v66_v25  ;;  %412 = vmatpush.msrb.mxu2 %v232_v23  ;;  %371 = vmatpush.msrb.mxu0 %v170_v24  ;;  %v96_v44 = vmul.f32 %v94_v12, %v73_v33  ;;  %v256_v12 = vld [vmem:[#allocation5 + $0x328] sm:$0xff]  ;;  %v158_v17 = vld [vmem:[#allocation5 + $0x18] sm:$0xff] }
  0x41   :  { %391 = vmatpush.msrb.mxu1 %v202_v28  ;;  %432 = vmatpush.msrb.mxu3 %v264_v29  ;;  %v130_v4 = vmax.f32 %v128_v47, %v129_v57  ;;  %v137_v6 = vmax.f32 %v135_v54, %v136_v1  ;;  %v220_v15 = vld [vmem:[#allocation5 + $0x208] sm:$0xff]  ;;  %v190_v18 = vld [vmem:[#allocation5 + $0x118] sm:$0xff] }
  0x42   :  { %v114_v41 = vmax.f32 %v112_v19, %v113_v30  ;;  %v121_v42 = vmax.f32 %v119_v20, %v120_v31  ;;  %v678_v48 = vsel %vm142_vm2, %v97_v38, %v95_v37  ;;  %413 = vmatpush.msrb.mxu2 %v230_v34  ;;  %372 = vmatpush.msrb.mxu0 %v168_v35  ;;  %v252_v19 = vld [vmem:[#allocation5 + $0x308] sm:$0xff] }
  0x43   :  { %299 = vmatmul.f32.vlgmr.msra.gmra.mxu0 %v678_v48  ;;  %392 = vmatpush.msrb.mxu1 %v200_v40  ;;  %v144_v58 = vsel %vm142_vm2, %v98_v49, %v96_v44  ;;  %v156_v20 = vld [vmem:[#allocation5 + $0x8] sm:$0xff] }
  0x44   :  { %v115_v51 = vrot.slane %v114_v41, 1  ;;  %v122_v52 = vrot.slane %v121_v42, 1  ;;  %414 = vmatpush.msrb.mxu2 %v228_v45  ;;  %433 = vmatpush.msrb.mxu3 %v262_v46  ;;  %v188_v21 = vld [vmem:[#allocation5 + $0x108] sm:$0xff] }
  0x45   :  { %319 = vmatmul.f32.vlgmr.msra.gmra.mxu1 %v144_v58  ;;  %373 = vmatpush.msrb.mxu0 %v166_v50 }
  0x46   :  { %v116_v63 = vmax.f32 %v114_v41, %v115_v51  ;;  %v123_v0 = vmax.f32 %v121_v42, %v122_v52  ;;  %393 = vmatpush.msrb.mxu1 %v198_v55  ;;  %415 = vmatpush.msrb.mxu2 %v226_v56 }
  0x47   :  { %434 = vmatpush.msrb.mxu3 %v260_v59  ;;  %374 = vmatpush.msrb.mxu0 %v164_v62 }
  0x48   :  { %v151_v8 = vsel %vm142_vm2, %v130_v4, %v116_v63  ;;  %394 = vmatpush.msrb.mxu1 %v196_v2  ;;  %416 = vmatpush.msrb.mxu2 %v224_v3  ;;  %v152_v11 = vsel %vm142_vm2, %v137_v6, %v123_v0 }
  0x49   :  { %339 = vmatmul.f32.vlgmr.msra.gmra.mxu2 %v151_v8  ;;  %435 = vmatpush.msrb.mxu3 %v258_v5 }
  0x4a   :  { %359 = vmatmul.f32.vlgmr.msra.gmra.mxu3 %v152_v11  ;;  %375 = vmatpush.msrb.mxu0 %v162_v7 }
  0x4b   :  { %395 = vmatpush.msrb.mxu1 %v194_v9  ;;  %417 = vmatpush.msrb.mxu2 %v222_v10 }
  0x4c   :  { %436 = vmatpush.msrb.mxu3 %v256_v12  ;;  %376 = vmatpush.msrb.mxu0 %v160_v13 }
  0x4d   :  { %396 = vmatpush.msrb.mxu1 %v192_v14  ;;  %418 = vmatpush.msrb.mxu2 %v220_v15 }
  0x4e   :  { %437 = vmatpush.msrb.mxu3 %v254_v16  ;;  %377 = vmatpush.msrb.mxu0 %v158_v17 }
  0x4f   :  { %397 = vmatpush.msrb.mxu1 %v190_v18 }
  0x50   :  { %438 = vmatpush.msrb.mxu3 %v252_v19  ;;  %378 = vmatpush.msrb.mxu0 %v156_v20 }
  0x51   :  { %419 = vmatmul.f32.vlgmr.msrb.gmra.mxu2 %v151_v8  ;;  %398 = vmatpush.msrb.mxu1 %v188_v21 }
  0x52   :  { %439 = vmatmul.f32.vlgmr.msrb.gmra.mxu3 %v152_v11  ;;  %379 = vmatmul.f32.vlgmr.msrb.gmra.mxu0 %v678_v48 }
  0x53   :  { %399 = vmatmul.f32.vlgmr.msrb.gmra.mxu1 %v144_v58 }
  0xc0   :  { %v300_v22 = vpop.f32.mrf.mxu0 }
  0xc2   :  { %v320_v23 = vpop.f32.mrf.mxu1 }
  0xc3   :  { %v321_v24 = vadd.f32 %v320_v23, %v300_v22 }
  0xcc   :  { %v340_v53 = vpop.f32.mrf.mxu2 }
  0xcd   :  { %v341_v25 = vadd.f32 %v340_v53, %v321_v24  ;;  %v360_v26 = vpop.f32.mrf.mxu3 }
  0xcf   :  { %v361_v27 = vadd.f32 %v360_v26, %v341_v25  ;;  %v380_v28 = vpop.f32.mrf.mxu0 }
  0xd0   :  { %v400_v29 = vpop.f32.mrf.mxu1 }
  0xd1   :  { %v522_v30 = vmul.f32 -1.442695, %v361_v27  ;;  %v401_v31 = vadd.f32 %v400_v29, %v380_v28 }
  0xd3   :  { %534 = vpow2.f32 %v522_v30 }
  0xd4   :  { %v420_v32 = vpop.f32.mrf.mxu2 }
  0xd5   :  { %v421_v33 = vadd.f32 %v420_v32, %v401_v31  ;;  %v440_v34 = vpop.f32.mrf.mxu3 }
  0xd7   :  { %v441_v35 = vadd.f32 %v440_v34, %v421_v33 }
  0xd9   :  { %v535_v36 = vpop.eup %534  ;;  %v523_v37 = vmul.f32 -1.442695, %v441_v35 }
  0xda   :  { %v449_v38 = vadd.f32 1.0, %v535_v36 }
  0xdb   :  { %536 = vpow2.f32 %v523_v37 }
  0xdc   :  { %538 = vrcp.f32 %v449_v38  ;;  %vm456_vm3 = vweird.f32 %v449_v38  ;;  %v460_v48 = vand.u32 2147483647, %v449_v38  ;;  %v462_v49 = vand.u32 2147483648, %v449_v38 }
  0xde   :  { %v463_v56 = vor.u32 1.1754944e-38, %v462_v49  ;;  %vm461_vm9 = vcmp.eq.f32.partialorder %v460_v48, 8.507059e+37 }
  0xe1   :  { %v537_v39 = vpop.eup %536 }
  0xe2   :  { %v539_v40 = vpop.eup %538  ;;  %v450_v41 = vadd.f32 1.0, %v537_v39 }
  0xe3   :  { %v452_v42 = vmul.f32 %v539_v40, %v449_v38  ;;  %vm457_vm4 = vweird.f32 %v539_v40 }
  0xe4   :  { %540 = vrcp.f32 %v450_v41  ;;  %v477_v50 = vand.u32 2147483648, %v450_v41  ;;  %v475_v54 = vand.u32 2147483647, %v450_v41  ;;  %vm458_vm6 = vmor %vm456_vm3, %vm457_vm4  ;;  %vm471_vm7 = vweird.f32 %v450_v41 }
  0xe5   :  { %v453_v43 = vsub.f32 1.0, %v452_v42 }
  0xe6   :  { %v478_v57 = vor.u32 1.1754944e-38, %v477_v50  ;;  %vm476_vm10 = vcmp.eq.f32.partialorder %v475_v54, 8.507059e+37 }
  0xe7   :  { %v454_v45 = vmul.f32 %v539_v40, %v453_v43 }
  0xe9   :  { %v455_v51 = vadd.f32 %v539_v40, %v454_v45 }
  0xea   :  { %v541_v44 = vpop.eup %540 }
  0xeb   :  { %v467_v46 = vmul.f32 %v541_v44, %v450_v41  ;;  %vm472_vm5 = vweird.f32 %v541_v44  ;;  %v459_v59 = vsel %vm458_vm6, %v539_v40, %v455_v51 }
  0xec   :  { %vm473_vm8 = vmor %vm471_vm7, %vm472_vm5  ;;  %v464_v0 = vsel %vm461_vm9, %v463_v56, %v459_v59 }
  0xed   :  { %v468_v47 = vsub.f32 1.0, %v467_v46 }
  0xef   :  { %v469_v52 = vmul.f32 %v541_v44, %v468_v47 }
  0xf1   :  { %v470_v55 = vadd.f32 %v541_v44, %v469_v52 }
  0xf3   :  { %v474_v58 = vsel %vm473_vm8, %v541_v44, %v470_v55 }
  0xf4   :  { %v479_v62 = vsel %vm476_vm10, %v478_v57, %v474_v58 }
  0xf5   :  { %v483_v63 = vrot.slane %v479_v62, 7 }
  0xf7   :  { %v485_v1 = vsel %vm484_vm11, %v464_v0, %v483_v63  ;;  %v486_v2 = vsel %vm142_vm2, %v464_v0, %v483_v63 }
  0xf8   :  { %v487_v3 = vrot.slane %v486_v2, 1  ;;  %v489_v4 = vperm.slane %v485_v1, 1  ;;  %v488_v5 = vperm.slane %v485_v1, 0 }
  0xfa   :  { %v491_v6 = vperm.slane %v487_v3, 1  ;;  %v492_v7 = vrot.slane %v489_v4, 4  ;;  %v490_v8 = vperm.slane %v487_v3, 0 }
  0xfc   :  { %v493_v9 = vrot.slane %v491_v6, 4  ;;  %v494_v10 = vsel %vm59_vm0, %v488_v5, %v492_v7 }
  0xfd   :  { %v498_v11 = vmul.f32 %v494_v10, %v654_v60 }
  0xfe   :  { %v495_v12 = vsel %vm59_vm0, %v490_v8, %v493_v9 }
  0xff   :  { %v499_v13 = vmul.f32 %v495_v12, %v656_v61  ;;  %500 = vst [vmem:[#allocation7] sm:$0xff] %v498_v11 }
 0x101   :  { %501 = vst [vmem:[#allocation7 + $0x8] sm:$0xff] %v499_v13 }
 0x102   :  { %514 = dma.vmem_to_hbm [thread:$0]  %s507_s22, 256, %s509_s25, [#allocation4], %s621_s17, %s621_s17, %s622_s18  }
 0x103   :  { %618 = dma.done.wait [#allocation4], 256  }
 0x104   :  { %619 = vsyncadd [#allocation4], 4294967040 }
 0x105   :  { %519 = vsyncpa [#allocation3], 1 }
 0x106   :  { %520 = vsyncpa [#allocation6], 1 }
 0x107   :  { %521 = vsyncpa [#allocation4], 1 }

// kernel: tpu_custom_call.1
= control target key start
LH: loop header
LB: loop body
LE: loop exit
PB: predicated region body
PF: predicated region fallthrough
CT: control target
= control target key end

     0   :  { %7 = vsyncpa [#allocation3], 0  ;;  %s696_s0 = inlined_call_operand.hbm [shape: f32[2,4,256], index: 0, kind: input, shape index: {}]   ;;  %s697_s1 = inlined_call_operand.hbm [shape: f32[512,256], index: 1, kind: input, shape index: {}]   ;;  %s698_s2 = inlined_call_operand.hbm [shape: f32[2,4,256], index: 2, kind: output, shape index: {}]  }
   0x1   :  { %8 = vsyncpa [#allocation6], 0 }
   0x2   :  { %9 = vsyncpa [#allocation4], 0  ;;  %s14_s11 = sshll.u32 %s696_s0, 4  ;;  %s620_s12 = smov [#allocation2]   ;;  %s15_s11 = int_to_ptr.hbm [resolvable:$true] %s14_s11 }
   0x3   :  { %s16_s13 = sshll.u32 %s620_s12, 4  ;;  %s27_s16 = sshll.u32 %s697_s1, 4  ;;  %s17_s13 = int_to_ptr.vmem [resolvable:$true] %s16_s13  ;;  %s28_s16 = int_to_ptr.hbm [resolvable:$true] %s27_s16 }
   0x4   :  { %s621_s17 = smov 128   ;;  %s622_s18 = smov 8  }
   0x5   :  { %22 = dma.hbm_to_vmem [thread:$0]  %s15_s11, 256, %s17_s13, [#allocation3], %s621_s17, %s621_s17, %s622_s18  }
   0x6   :  { %s623_s19 = smov [#allocation5]   ;;  %s624_s21 = smov 256  }
   0x7   :  { %s29_s20 = sshll.u32 %s623_s19, 4  ;;  %s625_s0 = smov 16   ;;  %s30_s20 = int_to_ptr.vmem [resolvable:$true] %s29_s20 }
   0x8   :  { %35 = dma.hbm_to_vmem [thread:$0]  %s28_s16, 16384, %s30_s20, [#allocation6], %s624_s21, %s624_s21, %s625_s0  }
   0x9   :  { %614 = dma.done.wait [#allocation3], 256  }
   0xa   :  { %615 = vsyncadd [#allocation3], 4294967040 }
   0xb   :  { %616 = dma.done.wait [#allocation6], 16384  }
   0xc   :  { %617 = vsyncadd [#allocation6], 4294950912  ;;  %v249_v0 = vld [vmem:[#allocation5 + $0x2f0] sm:$0xff]  ;;  %v247_v1 = vld [vmem:[#allocation5 + $0x2e0] sm:$0xff]  ;;  %v626_v42 = vmov 4.0   ;;  %vm59_vm0 = vcmask 1043456  }
   0xd   :  { %v281_v2 = vld [vmem:[#allocation5 + $0x3f0] sm:$0xff]  ;;  %323 = vmatpush.msra.mxu2 %v249_v0  ;;  %v279_v6 = vld [vmem:[#allocation5 + $0x3e0] sm:$0xff]  ;;  %532 = vrcp.f32 %v626_v42  ;;  %v656_v61 = vld [vmem:[#allocation2 + $0x8] sm:$0xff]  ;;  %vm142_vm2 = vcmask 1041409   ;;  %vm484_vm11 = vcmask 1040384   ;;  %s627_s1 = smov [#allocation7]  }
   0xe   :  { %343 = vmatpush.msra.mxu3 %v281_v2  ;;  %v185_v3 = vld [vmem:[#allocation5 + $0xf0] sm:$0xff]  ;;  %v183_v7 = vld [vmem:[#allocation5 + $0xe0] sm:$0xff]  ;;  %52 = vst [vmem:[#allocation1 + $0x10] ss:$2 sm:$0xff] %v656_v61  ;;  %s506_s22 = sshll.u32 %s627_s1, 4  ;;  %s508_s25 = sshll.u32 %s698_s2, 4  ;;  %s507_s22 = int_to_ptr.vmem [resolvable:$true] %s506_s22  ;;  %s509_s25 = int_to_ptr.hbm [resolvable:$true] %s508_s25 }
   0xf   :  { %v217_v4 = vld [vmem:[#allocation5 + $0x1f0] sm:$0xff]  ;;  %283 = vmatpush.msra.mxu0 %v185_v3  ;;  %v215_v8 = vld [vmem:[#allocation5 + $0x1e0] sm:$0xff]  ;;  %324 = vmatpush.msra.mxu2 %v247_v1  ;;  %v250_v3 = vld [vmem:[#allocation5 + $0x2f8] sm:$0xff] }
  0x10   :  { %v245_v5 = vld [vmem:[#allocation5 + $0x2d0] sm:$0xff]  ;;  %303 = vmatpush.msra.mxu1 %v217_v4  ;;  %344 = vmatpush.msra.mxu3 %v279_v6  ;;  %v243_v11 = vld [vmem:[#allocation5 + $0x2c0] sm:$0xff]  ;;  %v282_v4 = vld [vmem:[#allocation5 + $0x3f8] sm:$0xff] }
  0x11   :  { %v277_v9 = vld [vmem:[#allocation5 + $0x3d0] sm:$0xff]  ;;  %284 = vmatpush.msra.mxu0 %v183_v7  ;;  %v275_v13 = vld [vmem:[#allocation5 + $0x3c0] sm:$0xff]  ;;  %325 = vmatpush.msra.mxu2 %v245_v5  ;;  %v248_v5 = vld [vmem:[#allocation5 + $0x2e8] sm:$0xff] }
  0x12   :  { %v181_v10 = vld [vmem:[#allocation5 + $0xd0] sm:$0xff]  ;;  %304 = vmatpush.msra.mxu1 %v215_v8  ;;  %345 = vmatpush.msra.mxu3 %v277_v9  ;;  %v179_v14 = vld [vmem:[#allocation5 + $0xc0] sm:$0xff]  ;;  %v186_v8 = vld [vmem:[#allocation5 + $0xf8] sm:$0xff] }
  0x13   :  { %v213_v12 = vld [vmem:[#allocation5 + $0x1d0] sm:$0xff]  ;;  %v211_v15 = vld [vmem:[#allocation5 + $0x1c0] sm:$0xff]  ;;  %285 = vmatpush.msra.mxu0 %v181_v10  ;;  %326 = vmatpush.msra.mxu2 %v243_v11  ;;  %v652_v53 = vpop.eup %532  ;;  %v218_v9 = vld [vmem:[#allocation5 + $0x1f8] sm:$0xff] }
  0x14   :  { %305 = vmatpush.msra.mxu1 %v213_v12  ;;  %v241_v16 = vld [vmem:[#allocation5 + $0x2b0] sm:$0xff]  ;;  %346 = vmatpush.msra.mxu3 %v275_v13  ;;  %v239_v20 = vld [vmem:[#allocation5 + $0x2a0] sm:$0xff]  ;;  %v89_v0 = vmul.f32 4.0, %v652_v53  ;;  %v246_v10 = vld [vmem:[#allocation5 + $0x2d8] sm:$0xff]  ;;  %vm93_vm1 = vweird.f32 %v652_v53 }
  0x15   :  { %v273_v17 = vld [vmem:[#allocation5 + $0x3b0] sm:$0xff]  ;;  %286 = vmatpush.msra.mxu0 %v179_v14  ;;  %v271_v21 = vld [vmem:[#allocation5 + $0x3a0] sm:$0xff]  ;;  %327 = vmatpush.msra.mxu2 %v241_v16  ;;  %v280_v12 = vld [vmem:[#allocation5 + $0x3e8] sm:$0xff] }
  0x16   :  { %v177_v18 = vld [vmem:[#allocation5 + $0xb0] sm:$0xff]  ;;  %306 = vmatpush.msra.mxu1 %v211_v15  ;;  %347 = vmatpush.msra.mxu3 %v273_v17  ;;  %v175_v22 = vld [vmem:[#allocation5 + $0xa0] sm:$0xff]  ;;  %v90_v11 = vsub.f32 1.0, %v89_v0  ;;  %v184_v13 = vld [vmem:[#allocation5 + $0xe8] sm:$0xff] }
  0x17   :  { %v209_v19 = vld [vmem:[#allocation5 + $0x1b0] sm:$0xff]  ;;  %v207_v23 = vld [vmem:[#allocation5 + $0x1a0] sm:$0xff]  ;;  %287 = vmatpush.msra.mxu0 %v177_v18  ;;  %328 = vmatpush.msra.mxu2 %v239_v20  ;;  %v216_v14 = vld [vmem:[#allocation5 + $0x1e8] sm:$0xff] }
  0x18   :  { %307 = vmatpush.msra.mxu1 %v209_v19  ;;  %v237_v24 = vld [vmem:[#allocation5 + $0x290] sm:$0xff]  ;;  %348 = vmatpush.msra.mxu3 %v271_v21  ;;  %v235_v28 = vld [vmem:[#allocation5 + $0x280] sm:$0xff]  ;;  %v244_v15 = vld [vmem:[#allocation5 + $0x2c8] sm:$0xff] }
  0x19   :  { %v269_v25 = vld [vmem:[#allocation5 + $0x390] sm:$0xff]  ;;  %288 = vmatpush.msra.mxu0 %v175_v22  ;;  %v267_v29 = vld [vmem:[#allocation5 + $0x380] sm:$0xff]  ;;  %329 = vmatpush.msra.mxu2 %v237_v24  ;;  %v278_v16 = vld [vmem:[#allocation5 + $0x3d8] sm:$0xff] }
  0x1a   :  { %v173_v26 = vld [vmem:[#allocation5 + $0x90] sm:$0xff]  ;;  %308 = vmatpush.msra.mxu1 %v207_v23  ;;  %349 = vmatpush.msra.mxu3 %v269_v25  ;;  %v171_v30 = vld [vmem:[#allocation5 + $0x80] sm:$0xff]  ;;  %v182_v17 = vld [vmem:[#allocation5 + $0xd8] sm:$0xff] }
  0x1b   :  { %v205_v27 = vld [vmem:[#allocation5 + $0x190] sm:$0xff]  ;;  %v203_v31 = vld [vmem:[#allocation5 + $0x180] sm:$0xff]  ;;  %289 = vmatpush.msra.mxu0 %v173_v26  ;;  %330 = vmatpush.msra.mxu2 %v235_v28  ;;  %v214_v18 = vld [vmem:[#allocation5 + $0x1d8] sm:$0xff]  ;;  %v91_v26 = vmul.f32 %v652_v53, %v90_v11 }
  0x1c   :  { %309 = vmatpush.msra.mxu1 %v205_v27  ;;  %v233_v32 = vld [vmem:[#allocation5 + $0x270] sm:$0xff]  ;;  %350 = vmatpush.msra.mxu3 %v267_v29  ;;  %v231_v36 = vld [vmem:[#allocation5 + $0x260] sm:$0xff]  ;;  %v276_v19 = vld [vmem:[#allocation5 + $0x3c8] sm:$0xff] }
  0x1d   :  { %v265_v33 = vld [vmem:[#allocation5 + $0x370] sm:$0xff]  ;;  %290 = vmatpush.msra.mxu0 %v171_v30  ;;  %v263_v37 = vld [vmem:[#allocation5 + $0x360] sm:$0xff]  ;;  %331 = vmatpush.msra.mxu2 %v233_v32  ;;  %v242_v22 = vld [vmem:[#allocation5 + $0x2b8] sm:$0xff] }
  0x1e   :  { %v169_v34 = vld [vmem:[#allocation5 + $0x70] sm:$0xff]  ;;  %310 = vmatpush.msra.mxu1 %v203_v31  ;;  %351 = vmatpush.msra.mxu3 %v265_v33  ;;  %v167_v38 = vld [vmem:[#allocation5 + $0x60] sm:$0xff]  ;;  %v53_v23 = vld.sshfl [vmem:[#allocation1 + $0x10] sm:$0xff pattern:$0x75316420] }
  0x1f   :  { %v201_v35 = vld [vmem:[#allocation5 + $0x170] sm:$0xff]  ;;  %v199_v39 = vld [vmem:[#allocation5 + $0x160] sm:$0xff]  ;;  %291 = vmatpush.msra.mxu0 %v169_v34  ;;  %332 = vmatpush.msra.mxu2 %v231_v36  ;;  %v180_v25 = vld [vmem:[#allocation5 + $0xc8] sm:$0xff]  ;;  %v74_v28 = vsel %vm59_vm0, %v53_v23, 0.0 }
  0x20   :  { %311 = vmatpush.msra.mxu1 %v201_v35  ;;  %v229_v40 = vld [vmem:[#allocation5 + $0x250] sm:$0xff]  ;;  %352 = vmatpush.msra.mxu3 %v263_v37  ;;  %v227_v45 = vld [vmem:[#allocation5 + $0x240] sm:$0xff]  ;;  %v75_v32 = vrot.slane %v74_v28, 4  ;;  %v212_v35 = vld [vmem:[#allocation5 + $0x1c8] sm:$0xff] }
  0x21   :  { %v261_v41 = vld [vmem:[#allocation5 + $0x350] sm:$0xff]  ;;  %292 = vmatpush.msra.mxu0 %v167_v38  ;;  %v259_v46 = vld [vmem:[#allocation5 + $0x340] sm:$0xff]  ;;  %333 = vmatpush.msra.mxu2 %v229_v40  ;;  %v274_v36 = vld [vmem:[#allocation5 + $0x3b8] sm:$0xff] }
  0x22   :  { %v165_v43 = vld [vmem:[#allocation5 + $0x50] sm:$0xff]  ;;  %312 = vmatpush.msra.mxu1 %v199_v39  ;;  %353 = vmatpush.msra.mxu3 %v261_v41  ;;  %v163_v47 = vld [vmem:[#allocation5 + $0x40] sm:$0xff]  ;;  %v240_v37 = vld [vmem:[#allocation5 + $0x2a8] sm:$0xff]  ;;  %v76_v41 = vadd.f32 %v75_v32, %v74_v28 }
  0x23   :  { %v197_v44 = vld [vmem:[#allocation5 + $0x150] sm:$0xff]  ;;  %v195_v48 = vld [vmem:[#allocation5 + $0x140] sm:$0xff]  ;;  %293 = vmatpush.msra.mxu0 %v165_v43  ;;  %334 = vmatpush.msra.mxu2 %v227_v45  ;;  %v178_v38 = vld [vmem:[#allocation5 + $0xb8] sm:$0xff] }
  0x24   :  { %313 = vmatpush.msra.mxu1 %v197_v44  ;;  %v225_v49 = vld [vmem:[#allocation5 + $0x230] sm:$0xff]  ;;  %354 = vmatpush.msra.mxu3 %v259_v46  ;;  %v223_v54 = vld [vmem:[#allocation5 + $0x220] sm:$0xff]  ;;  %v210_v39 = vld [vmem:[#allocation5 + $0x1b8] sm:$0xff] }
  0x25   :  { %v257_v50 = vld [vmem:[#allocation5 + $0x330] sm:$0xff]  ;;  %294 = vmatpush.msra.mxu0 %v163_v47  ;;  %v255_v55 = vld [vmem:[#allocation5 + $0x320] sm:$0xff]  ;;  %335 = vmatpush.msra.mxu2 %v225_v49  ;;  %v238_v43 = vld [vmem:[#allocation5 + $0x298] sm:$0xff]  ;;  %v92_v49 = vadd.f32 %v652_v53, %v91_v26 }
  0x26   :  { %v161_v51 = vld [vmem:[#allocation5 + $0x30] sm:$0xff]  ;;  %314 = vmatpush.msra.mxu1 %v195_v48  ;;  %355 = vmatpush.msra.mxu3 %v257_v50  ;;  %v159_v57 = vld [vmem:[#allocation5 + $0x20] sm:$0xff]  ;;  %v272_v44 = vld [vmem:[#allocation5 + $0x3a8] sm:$0xff]  ;;  %v77_v48 = vrot.slane %v76_v41, 2 }
  0x27   :  { %v193_v52 = vld [vmem:[#allocation5 + $0x130] sm:$0xff]  ;;  %v191_v58 = vld [vmem:[#allocation5 + $0x120] sm:$0xff]  ;;  %295 = vmatpush.msra.mxu0 %v161_v51  ;;  %336 = vmatpush.msra.mxu2 %v223_v54  ;;  %v176_v46 = vld [vmem:[#allocation5 + $0xa8] sm:$0xff] }
  0x28   :  { %v221_v56 = vld [vmem:[#allocation5 + $0x210] sm:$0xff]  ;;  %315 = vmatpush.msra.mxu1 %v193_v52  ;;  %356 = vmatpush.msra.mxu3 %v255_v55  ;;  %v219_v1 = vld [vmem:[#allocation5 + $0x200] sm:$0xff]  ;;  %v208_v51 = vld [vmem:[#allocation5 + $0x1a8] sm:$0xff]  ;;  %v78_v0 = vadd.f32 %v77_v48, %v76_v41 }
  0x29   :  { %v253_v59 = vld [vmem:[#allocation5 + $0x310] sm:$0xff]  ;;  %296 = vmatpush.msra.mxu0 %v159_v57  ;;  %v251_v2 = vld [vmem:[#allocation5 + $0x300] sm:$0xff]  ;;  %337 = vmatpush.msra.mxu2 %v221_v56  ;;  %v236_v52 = vld [vmem:[#allocation5 + $0x288] sm:$0xff] }
  0x2a   :  { %v654_v60 = vld [vmem:[#allocation2] sm:$0xff]  ;;  %316 = vmatpush.msra.mxu1 %v191_v58  ;;  %357 = vmatpush.msra.mxu3 %v253_v59  ;;  %v155_v6 = vld [vmem:[#allocation5] sm:$0xff]  ;;  %v270_v54 = vld [vmem:[#allocation5 + $0x398] sm:$0xff] }
  0x2b   :  { %v157_v62 = vld [vmem:[#allocation5 + $0x10] sm:$0xff]  ;;  %48 = vst [vmem:[#allocation1] ss:$2 sm:$0xff] %v654_v60  ;;  %v187_v7 = vld [vmem:[#allocation5 + $0x100] sm:$0xff]  ;;  %338 = vmatpush.msra.mxu2 %v219_v1  ;;  %v174_v56 = vld [vmem:[#allocation5 + $0x98] sm:$0xff] }
  0x2c   :  { %v189_v63 = vld [vmem:[#allocation5 + $0x110] sm:$0xff]  ;;  %297 = vmatpush.msra.mxu0 %v157_v62  ;;  %358 = vmatpush.msra.mxu3 %v251_v2  ;;  %v54_v24 = vld.sshfl [vmem:[#allocation1 + $0x18] sm:$0xff pattern:$0x75316420]  ;;  %v206_v57 = vld [vmem:[#allocation5 + $0x198] sm:$0xff] }
  0x2d   :  { %317 = vmatpush.msra.mxu1 %v189_v63  ;;  %403 = vmatpush.msrb.mxu2 %v250_v3  ;;  %v81_v30 = vsel %vm59_vm0, %v54_v24, 0.0  ;;  %103 = vst [vmem:[#allocation1 + $0x10] ss:$2 sm:$0xff] %v656_v61  ;;  %v268_v58 = vld [vmem:[#allocation5 + $0x388] sm:$0xff]  ;;  %v234_v2 = vld [vmem:[#allocation5 + $0x278] sm:$0xff] }
  0x2e   :  { %423 = vmatpush.msrb.mxu3 %v282_v4  ;;  %298 = vmatpush.msra.mxu0 %v155_v6  ;;  %v82_v34 = vrot.slane %v81_v30, 4  ;;  %v232_v23 = vld [vmem:[#allocation5 + $0x268] sm:$0xff]  ;;  %v170_v24 = vld [vmem:[#allocation5 + $0x78] sm:$0xff] }
  0x2f   :  { %318 = vmatpush.msra.mxu1 %v187_v7  ;;  %404 = vmatpush.msrb.mxu2 %v248_v5  ;;  %v172_v7 = vld [vmem:[#allocation5 + $0x88] sm:$0xff]  ;;  %v202_v28 = vld [vmem:[#allocation5 + $0x178] sm:$0xff] }
  0x30   :  { %363 = vmatpush.msrb.mxu0 %v186_v8  ;;  %424 = vmatpush.msrb.mxu3 %v280_v12  ;;  %v83_v45 = vadd.f32 %v82_v34, %v81_v30  ;;  %v94_v12 = vsel %vm93_vm1, %v652_v53, %v92_v49  ;;  %v230_v34 = vld [vmem:[#allocation5 + $0x258] sm:$0xff] }
  0x31   :  { %383 = vmatpush.msrb.mxu1 %v218_v9  ;;  %405 = vmatpush.msrb.mxu2 %v246_v10 }
  0x32   :  { %v49_v20 = vld.sshfl [vmem:[#allocation1] sm:$0xff pattern:$0x75316420]  ;;  %v50_v21 = vld.sshfl [vmem:[#allocation1 + $0x8] sm:$0xff pattern:$0x75316420]  ;;  %364 = vmatpush.msrb.mxu0 %v184_v13  ;;  %425 = vmatpush.msrb.mxu3 %v278_v16 }
  0x33   :  { %99 = vst [vmem:[#allocation1] ss:$2 sm:$0xff] %v654_v60  ;;  %v60_v27 = vsel %vm59_vm0, %v49_v20, 0.0  ;;  %v67_v29 = vsel %vm59_vm0, %v50_v21, 0.0  ;;  %384 = vmatpush.msrb.mxu1 %v216_v14  ;;  %406 = vmatpush.msrb.mxu2 %v244_v15  ;;  %v84_v55 = vrot.slane %v83_v45, 2  ;;  %v79_v16 = vrot.slane %v78_v0, 1 }
  0x34   :  { %v61_v31 = vrot.slane %v60_v27, 4  ;;  %v68_v33 = vrot.slane %v67_v29, 4  ;;  %365 = vmatpush.msrb.mxu0 %v182_v17  ;;  %426 = vmatpush.msrb.mxu3 %v276_v19  ;;  %v104_v3 = vld.sshfl [vmem:[#allocation1 + $0x10] sm:$0xff pattern:$0x75316420]  ;;  %v204_v17 = vld [vmem:[#allocation5 + $0x188] sm:$0xff] }
  0x35   :  { %385 = vmatpush.msrb.mxu1 %v214_v18  ;;  %407 = vmatpush.msrb.mxu2 %v242_v22  ;;  %v85_v6 = vadd.f32 %v84_v55, %v83_v45  ;;  %v124_v9 = vsel %vm59_vm0, %v104_v3, -inf  ;;  %v105_v10 = vld.sshfl [vmem:[#allocation1 + $0x18] sm:$0xff pattern:$0x75316420]  ;;  %v266_v18 = vld [vmem:[#allocation5 + $0x378] sm:$0xff]  ;;  %v80_v26 = vadd.f32 %v79_v16, %v78_v0  ;;  %v228_v45 = vld [vmem:[#allocation5 + $0x248] sm:$0xff] }
  0x36   :  { %v62_v40 = vadd.f32 %v61_v31, %v60_v27  ;;  %v69_v42 = vadd.f32 %v68_v33, %v67_v29  ;;  %366 = vmatpush.msrb.mxu0 %v180_v25  ;;  %427 = vmatpush.msrb.mxu3 %v274_v36  ;;  %v125_v13 = vrot.slane %v124_v9, 4  ;;  %v131_v14 = vsel %vm59_vm0, %v105_v10, -inf  ;;  %v264_v29 = vld [vmem:[#allocation5 + $0x368] sm:$0xff]  ;;  %v198_v55 = vld [vmem:[#allocation5 + $0x158] sm:$0xff] }
  0x37   :  { %386 = vmatpush.msrb.mxu1 %v212_v35  ;;  %408 = vmatpush.msrb.mxu2 %v240_v37  ;;  %v132_v21 = vrot.slane %v131_v14, 4  ;;  %v86_v27 = vrot.slane %v85_v6, 1  ;;  %v168_v35 = vld [vmem:[#allocation5 + $0x68] sm:$0xff]  ;;  %v222_v10 = vld [vmem:[#allocation5 + $0x218] sm:$0xff] }
  0x38   :  { %v63_v47 = vrot.slane %v62_v40, 2  ;;  %v70_v50 = vrot.slane %v69_v42, 2  ;;  %367 = vmatpush.msrb.mxu0 %v178_v38  ;;  %428 = vmatpush.msrb.mxu3 %v272_v44  ;;  %v126_v53 = vmax.f32 %v124_v9, %v125_v13  ;;  %v97_v38 = vmul.f32 %v94_v12, %v80_v26  ;;  %v224_v3 = vld [vmem:[#allocation5 + $0x228] sm:$0xff]  ;;  %v194_v9 = vld [vmem:[#allocation5 + $0x138] sm:$0xff] }
  0x39   :  { %387 = vmatpush.msrb.mxu1 %v210_v39  ;;  %409 = vmatpush.msrb.mxu2 %v238_v43  ;;  %v133_v32 = vmax.f32 %v131_v14, %v132_v21  ;;  %v87_v39 = vadd.f32 %v86_v27, %v85_v6  ;;  %v160_v13 = vld [vmem:[#allocation5 + $0x28] sm:$0xff]  ;;  %v254_v16 = vld [vmem:[#allocation5 + $0x318] sm:$0xff] }
  0x3a   :  { %v100_v59 = vld.sshfl [vmem:[#allocation1] sm:$0xff pattern:$0x75316420]  ;;  %v101_v62 = vld.sshfl [vmem:[#allocation1 + $0x8] sm:$0xff pattern:$0x75316420]  ;;  %v64_v63 = vadd.f32 %v63_v47, %v62_v40  ;;  %v71_v1 = vadd.f32 %v70_v50, %v69_v42  ;;  %368 = vmatpush.msrb.mxu0 %v176_v46  ;;  %429 = vmatpush.msrb.mxu3 %v270_v54 }
  0x3b   :  { %v110_v4 = vsel %vm59_vm0, %v100_v59, -inf  ;;  %v117_v5 = vsel %vm59_vm0, %v101_v62, -inf  ;;  %388 = vmatpush.msrb.mxu1 %v208_v51  ;;  %410 = vmatpush.msrb.mxu2 %v236_v52  ;;  %v127_v36 = vrot.slane %v126_v53, 2  ;;  %v200_v40 = vld [vmem:[#allocation5 + $0x168] sm:$0xff]  ;;  %v134_v43 = vrot.slane %v133_v32, 2  ;;  %v262_v46 = vld [vmem:[#allocation5 + $0x358] sm:$0xff] }
  0x3c   :  { %v111_v8 = vrot.slane %v110_v4, 4  ;;  %v118_v11 = vrot.slane %v117_v5, 4  ;;  %v65_v15 = vrot.slane %v64_v63, 1  ;;  %369 = vmatpush.msrb.mxu0 %v174_v56  ;;  %v72_v22 = vrot.slane %v71_v1, 1  ;;  %430 = vmatpush.msrb.mxu3 %v268_v58  ;;  %v166_v50 = vld [vmem:[#allocation5 + $0x58] sm:$0xff]  ;;  %v260_v59 = vld [vmem:[#allocation5 + $0x348] sm:$0xff] }
  0x3d   :  { %389 = vmatpush.msrb.mxu1 %v206_v57  ;;  %411 = vmatpush.msrb.mxu2 %v234_v2  ;;  %v128_v47 = vmax.f32 %v126_v53, %v127_v36  ;;  %v98_v49 = vmul.f32 %v94_v12, %v87_v39  ;;  %v135_v54 = vmax.f32 %v133_v32, %v134_v43  ;;  %v226_v56 = vld [vmem:[#allocation5 + $0x238] sm:$0xff]  ;;  %v164_v62 = vld [vmem:[#allocation5 + $0x48] sm:$0xff] }
  0x3e   :  { %v112_v19 = vmax.f32 %v110_v4, %v111_v8  ;;  %v119_v20 = vmax.f32 %v117_v5, %v118_v11  ;;  %v66_v25 = vadd.f32 %v65_v15, %v64_v63  ;;  %370 = vmatpush.msrb.mxu0 %v172_v7  ;;  %v73_v33 = vadd.f32 %v72_v22, %v71_v1  ;;  %v196_v2 = vld [vmem:[#allocation5 + $0x148] sm:$0xff]  ;;  %v258_v5 = vld [vmem:[#allocation5 + $0x338] sm:$0xff] }
  0x3f   :  { %390 = vmatpush.msrb.mxu1 %v204_v17  ;;  %431 = vmatpush.msrb.mxu3 %v266_v18  ;;  %v129_v57 = vrot.slane %v128_v47, 1  ;;  %v136_v1 = vrot.slane %v135_v54, 1  ;;  %v162_v7 = vld [vmem:[#allocation5 + $0x38] sm:$0xff]  ;;  %v192_v14 = vld [vmem:[#allocation5 + $0x128] sm:$0xff] }
  0x40   :  { %v113_v30 = vrot.slane %v112_v19, 2  ;;  %v120_v31 = vrot.slane %v119_v20, 2  ;;  %v95_v37 = vmul.f32 %v94_v12, %v66_v25  ;;  %412 = vmatpush.msrb.mxu2 %v232_v23  ;;  %371 = vmatpush.msrb.mxu0 %v170_v24  ;;  %v96_v44 = vmul.f32 %v94_v12, %v73_v33  ;;  %v256_v12 = vld [vmem:[#allocation5 + $0x328] sm:$0xff]  ;;  %v158_v17 = vld [vmem:[#allocation5 + $0x18] sm:$0xff] }
  0x41   :  { %391 = vmatpush.msrb.mxu1 %v202_v28  ;;  %432 = vmatpush.msrb.mxu3 %v264_v29  ;;  %v130_v4 = vmax.f32 %v128_v47, %v129_v57  ;;  %v137_v6 = vmax.f32 %v135_v54, %v136_v1  ;;  %v220_v15 = vld [vmem:[#allocation5 + $0x208] sm:$0xff]  ;;  %v190_v18 = vld [vmem:[#allocation5 + $0x118] sm:$0xff] }
  0x42   :  { %v114_v41 = vmax.f32 %v112_v19, %v113_v30  ;;  %v121_v42 = vmax.f32 %v119_v20, %v120_v31  ;;  %v678_v48 = vsel %vm142_vm2, %v97_v38, %v95_v37  ;;  %413 = vmatpush.msrb.mxu2 %v230_v34  ;;  %372 = vmatpush.msrb.mxu0 %v168_v35  ;;  %v252_v19 = vld [vmem:[#allocation5 + $0x308] sm:$0xff] }
  0x43   :  { %299 = vmatmul.f32.vlgmr.msra.gmra.mxu0 %v678_v48  ;;  %392 = vmatpush.msrb.mxu1 %v200_v40  ;;  %v144_v58 = vsel %vm142_vm2, %v98_v49, %v96_v44  ;;  %v156_v20 = vld [vmem:[#allocation5 + $0x8] sm:$0xff] }
  0x44   :  { %v115_v51 = vrot.slane %v114_v41, 1  ;;  %v122_v52 = vrot.slane %v121_v42, 1  ;;  %414 = vmatpush.msrb.mxu2 %v228_v45  ;;  %433 = vmatpush.msrb.mxu3 %v262_v46  ;;  %v188_v21 = vld [vmem:[#allocation5 + $0x108] sm:$0xff] }
  0x45   :  { %319 = vmatmul.f32.vlgmr.msra.gmra.mxu1 %v144_v58  ;;  %373 = vmatpush.msrb.mxu0 %v166_v50 }
  0x46   :  { %v116_v63 = vmax.f32 %v114_v41, %v115_v51  ;;  %v123_v0 = vmax.f32 %v121_v42, %v122_v52  ;;  %393 = vmatpush.msrb.mxu1 %v198_v55  ;;  %415 = vmatpush.msrb.mxu2 %v226_v56 }
  0x47   :  { %434 = vmatpush.msrb.mxu3 %v260_v59  ;;  %374 = vmatpush.msrb.mxu0 %v164_v62 }
  0x48   :  { %v151_v8 = vsel %vm142_vm2, %v130_v4, %v116_v63  ;;  %394 = vmatpush.msrb.mxu1 %v196_v2  ;;  %416 = vmatpush.msrb.mxu2 %v224_v3  ;;  %v152_v11 = vsel %vm142_vm2, %v137_v6, %v123_v0 }
  0x49   :  { %339 = vmatmul.f32.vlgmr.msra.gmra.mxu2 %v151_v8  ;;  %435 = vmatpush.msrb.mxu3 %v258_v5 }
  0x4a   :  { %359 = vmatmul.f32.vlgmr.msra.gmra.mxu3 %v152_v11  ;;  %375 = vmatpush.msrb.mxu0 %v162_v7 }
  0x4b   :  { %395 = vmatpush.msrb.mxu1 %v194_v9  ;;  %417 = vmatpush.msrb.mxu2 %v222_v10 }
  0x4c   :  { %436 = vmatpush.msrb.mxu3 %v256_v12  ;;  %376 = vmatpush.msrb.mxu0 %v160_v13 }
  0x4d   :  { %396 = vmatpush.msrb.mxu1 %v192_v14  ;;  %418 = vmatpush.msrb.mxu2 %v220_v15 }
  0x4e   :  { %437 = vmatpush.msrb.mxu3 %v254_v16  ;;  %377 = vmatpush.msrb.mxu0 %v158_v17 }
  0x4f   :  { %397 = vmatpush.msrb.mxu1 %v190_v18 }
  0x50   :  { %438 = vmatpush.msrb.mxu3 %v252_v19  ;;  %378 = vmatpush.msrb.mxu0 %v156_v20 }
  0x51   :  { %419 = vmatmul.f32.vlgmr.msrb.gmra.mxu2 %v151_v8  ;;  %398 = vmatpush.msrb.mxu1 %v188_v21 }
  0x52   :  { %439 = vmatmul.f32.vlgmr.msrb.gmra.mxu3 %v152_v11  ;;  %379 = vmatmul.f32.vlgmr.msrb.gmra.mxu0 %v678_v48 }
  0x53   :  { %399 = vmatmul.f32.vlgmr.msrb.gmra.mxu1 %v144_v58 }
  0xc0   :  { %v300_v22 = vpop.f32.mrf.mxu0 }
  0xc2   :  { %v320_v23 = vpop.f32.mrf.mxu1 }
  0xc3   :  { %v321_v24 = vadd.f32 %v320_v23, %v300_v22 }
  0xcc   :  { %v340_v53 = vpop.f32.mrf.mxu2 }
  0xcd   :  { %v341_v25 = vadd.f32 %v340_v53, %v321_v24  ;;  %v360_v26 = vpop.f32.mrf.mxu3 }
  0xcf   :  { %v361_v27 = vadd.f32 %v360_v26, %v341_v25  ;;  %v380_v28 = vpop.f32.mrf.mxu0 }
  0xd0   :  { %v400_v29 = vpop.f32.mrf.mxu1 }
  0xd1   :  { %v522_v30 = vmul.f32 -1.442695, %v361_v27  ;;  %v401_v31 = vadd.f32 %v400_v29, %v380_v28 }
  0xd3   :  { %534 = vpow2.f32 %v522_v30 }
  0xd4   :  { %v420_v32 = vpop.f32.mrf.mxu2 }
  0xd5   :  { %v421_v33 = vadd.f32 %v420_v32, %v401_v31  ;;  %v440_v34 = vpop.f32.mrf.mxu3 }
  0xd7   :  { %v441_v35 = vadd.f32 %v440_v34, %v421_v33 }
  0xd9   :  { %v535_v36 = vpop.eup %534  ;;  %v523_v37 = vmul.f32 -1.442695, %v441_v35 }
  0xda   :  { %v449_v38 = vadd.f32 1.0, %v535_v36 }
  0xdb   :  { %536 = vpow2.f32 %v523_v37 }
  0xdc   :  { %538 = vrcp.f32 %v449_v38  ;;  %vm456_vm3 = vweird.f32 %v449_v38  ;;  %v460_v48 = vand.u32 2147483647, %v449_v38  ;;  %v462_v49 = vand.u32 2147483648, %v449_v38 }
  0xde   :  { %v463_v56 = vor.u32 1.1754944e-38, %v462_v49  ;;  %vm461_vm9 = vcmp.eq.f32.partialorder %v460_v48, 8.507059e+37 }
  0xe1   :  { %v537_v39 = vpop.eup %536 }
  0xe2   :  { %v539_v40 = vpop.eup %538  ;;  %v450_v41 = vadd.f32 1.0, %v537_v39 }
  0xe3   :  { %v452_v42 = vmul.f32 %v539_v40, %v449_v38  ;;  %vm457_vm4 = vweird.f32 %v539_v40 }
  0xe4   :  { %540 = vrcp.f32 %v450_v41  ;;  %v477_v50 = vand.u32 2147483648, %v450_v41  ;;  %v475_v54 = vand.u32 2147483647, %v450_v41  ;;  %vm458_vm6 = vmor %vm456_vm3, %vm457_vm4  ;;  %vm471_vm7 = vweird.f32 %v450_v41 }
  0xe5   :  { %v453_v43 = vsub.f32 1.0, %v452_v42 }
  0xe6   :  { %v478_v57 = vor.u32 1.1754944e-38, %v477_v50  ;;  %vm476_vm10 = vcmp.eq.f32.partialorder %v475_v54, 8.507059e+37 }
  0xe7   :  { %v454_v45 = vmul.f32 %v539_v40, %v453_v43 }
  0xe9   :  { %v455_v51 = vadd.f32 %v539_v40, %v454_v45 }
  0xea   :  { %v541_v44 = vpop.eup %540 }
  0xeb   :  { %v467_v46 = vmul.f32 %v541_v44, %v450_v41  ;;  %vm472_vm5 = vweird.f32 %v541_v44  ;;  %v459_v59 = vsel %vm458_vm6, %v539_v40, %v455_v51 }
  0xec   :  { %vm473_vm8 = vmor %vm471_vm7, %vm472_vm5  ;;  %v464_v0 = vsel %vm461_vm9, %v463_v56, %v459_v59 }
  0xed   :  { %v468_v47 = vsub.f32 1.0, %v467_v46 }
  0xef   :  { %v469_v52 = vmul.f32 %v541_v44, %v468_v47 }
  0xf1   :  { %v470_v55 = vadd.f32 %v541_v44, %v469_v52 }
  0xf3   :  { %v474_v58 = vsel %vm473_vm8, %v541_v44, %v470_v55 }
  0xf4   :  { %v479_v62 = vsel %vm476_vm10, %v478_v57, %v474_v58 }
  0xf5   :  { %v483_v63 = vrot.slane %v479_v62, 7 }
  0xf7   :  { %v485_v1 = vsel %vm484_vm11, %v464_v0, %v483_v63  ;;  %v486_v2 = vsel %vm142_vm2, %v464_v0, %v483_v63 }
  0xf8   :  { %v487_v3 = vrot.slane %v486_v2, 1  ;;  %v489_v4 = vperm.slane %v485_v1, 1  ;;  %v488_v5 = vperm.slane %v485_v1, 0 }
  0xfa   :  { %v491_v6 = vperm.slane %v487_v3, 1  ;;  %v492_v7 = vrot.slane %v489_v4, 4  ;;  %v490_v8 = vperm.slane %v487_v3, 0 }
  0xfc   :  { %v493_v9 = vrot.slane %v491_v6, 4  ;;  %v494_v10 = vsel %vm59_vm0, %v488_v5, %v492_v7 }
  0xfd   :  { %v498_v11 = vmul.f32 %v494_v10, %v654_v60 }
  0xfe   :  { %v495_v12 = vsel %vm59_vm0, %v490_v8, %v493_v9 }
  0xff   :  { %v499_v13 = vmul.f32 %v495_v12, %v656_v61  ;;  %500 = vst [vmem:[#allocation7] sm:$0xff] %v498_v11 }
 0x101   :  { %501 = vst [vmem:[#allocation7 + $0x8] sm:$0xff] %v499_v13 }
 0x102   :  { %514 = dma.vmem_to_hbm [thread:$0]  %s507_s22, 256, %s509_s25, [#allocation4], %s621_s17, %s621_s17, %s622_s18  }
 0x103   :  { %618 = dma.done.wait [#allocation4], 256  }
 0x104   :  { %619 = vsyncadd [#allocation4], 4294967040 }
 0x105   :  { %519 = vsyncpa [#allocation3], 1 }
 0x106   :  { %520 = vsyncpa [#allocation6], 1 }
 0x107   :  { %521 = vsyncpa [#allocation4], 1 }

</bundles_post_ra>
